<compile_context>
chip_gen: v5e
topology: v5e:2x2
jax: 0.10.0
libtpu: 0.0.40
codegen_flags: <defaults>
</compile_context>

<pallas_src>
import functools

import jax
import jax.numpy as jnp
from jax import lax
from jax.experimental import pallas as pl
from jax.experimental.pallas import tpu as pltpu


# -----------------------------------------------------------------------------
# Fused kernel: projections + edge attention + grouped softmax + aggregation + FC
# -----------------------------------------------------------------------------
def _agg_fc_kernel(src_col_ref, dst_col_ref, dst_row_ref, ef_ref,
                   lig_ref, pkt_ref,
                   wl_ref, bl_ref, wp_ref, bp_ref, we_ref, be_ref,
                   prelu_ref, attw_ref, attb_ref,
                   fcw1_ref, fcb1_ref, bn1s_ref, bn1o_ref,
                   fcw2_ref, fcb2_ref, bn2s_ref, bn2o_ref,
                   fcw3_ref, fcb3_ref,
                   out_ref,
                   hn_l_s, hn_p_s, m_s, l_s, accn_s):
    f32, bf16 = jnp.float32, jnp.bfloat16
    NEG = f32(-1e30)          # finite "-inf": exp(NEG - NEG) == 1 (no NaNs)

    t = pl.program_id(0)               # edge-tile index (single pass)
    n_tiles = pl.num_programs(0)

    TE = ef_ref.shape[0]
    NL_p, H2 = hn_l_s.shape            # H2 = 2 * H_p  (prj | w halves)
    NP_p = hn_p_s.shape[0]
    H = H2 // 2

    # ---- one-time init: fused node projections (N = 2H, stay VMEM-resident) --
    @pl.when(t == 0)
    def _init():
        hn_l_s[...] = (jnp.dot(lig_ref[...], wl_ref[...],
                               preferred_element_type=f32) + bl_ref[...]).astype(bf16)
        hn_p_s[...] = (jnp.dot(pkt_ref[...], wp_ref[...],
                               preferred_element_type=f32) + bp_ref[...]).astype(bf16)
        m_s[...] = jnp.full_like(m_s, NEG)       # per-dst-node running max
        l_s[...] = jnp.zeros_like(l_s)           # per-dst-node softmax denom
        accn_s[...] = jnp.zeros_like(accn_s)     # per-dst-node numerator [NP_p, H]
        out_ref[...] = jnp.zeros_like(out_ref)

    # ---- one-hot gather / scatter matrices built in-kernel ------------------
    src_col = src_col_ref[...]                   # [TE, 1] int32 (-1 = pad)
    dst_col = dst_col_ref[...]                   # [TE, 1] int32 (-1 = pad)
    dst_row = dst_row_ref[0]                     # [1, TE] int32 (lane-dense copy)

    lane_l = lax.broadcasted_iota(jnp.int32, (TE, NL_p), 1)
    lane_p = lane_l if NP_p == NL_p else lax.broadcasted_iota(jnp.int32, (TE, NP_p), 1)
    src_oh = (lane_l == src_col).astype(bf16)            # [TE, NL_p] gather src
    dst_mask = lane_p == dst_col                         # [TE, NP_p]
    dst_oh = dst_mask.astype(bf16)                       # gather dst
    # transposed one-hot for the scatter matmul (sublane iota, no XLU transpose)
    dst_ohT = (lax.broadcasted_iota(jnp.int32, (NP_p, TE), 0) == dst_row).astype(bf16)

    # ---- fused edge / gather matmuls (N = 2H) -------------------------------
    e_all = jnp.dot(ef_ref[...], we_ref[...], preferred_element_type=f32) + be_ref[...]
    hn_src = jnp.dot(src_oh, hn_l_s[...], preferred_element_type=f32)    # [TE, 2H]
    hn_dst = jnp.dot(dst_oh, hn_p_s[...], preferred_element_type=f32)    # [TE, 2H]

    # ---- attention score (VPU PReLU + lane reduce, no N=1 MXU matmul) -------
    w = hn_src[:, :H] + hn_dst[:, :H] + e_all[:, :H]
    alpha = prelu_ref[0, 0]
    w = jnp.where(w >= 0, w, alpha * w)                                   # PReLU
    s = jnp.sum(w * attw_ref[...], axis=-1, keepdims=True) + attb_ref[0, 0]  # [TE,1]

    # ---- single-pass online edge-softmax grouped by destination node --------
    masked_s = jnp.where(dst_mask, s, NEG)                                # [TE, NP_p]
    tile_max = jnp.max(masked_s, axis=0, keepdims=True)                   # [1, NP_p]
    m_old = m_s[...]
    m_new = jnp.maximum(m_old, tile_max)
    corr = jnp.exp(m_old - m_new)                                         # [1, NP_p]
    m_edge = jnp.sum(jnp.where(dst_mask, m_new, 0.0), axis=1, keepdims=True)   # [TE,1]
    p = jnp.where(dst_col >= 0, jnp.exp(s - m_edge), 0.0)                 # [TE, 1]
    l_s[...] = corr * l_s[...] + jnp.sum(jnp.where(dst_mask, p, 0.0),
                                         axis=0, keepdims=True)
    m_s[...] = m_new

    # ---- numerator scatter-add: acc[n] = corr[n]*acc[n] + sum_{dst(e)=n} p*f -
    feat = (p * e_all[:, H:] * hn_src[:, H:] * hn_dst[:, H:]).astype(bf16)  # [TE, H]
    delta = jnp.dot(dst_ohT, feat, preferred_element_type=f32)              # [NP_p, H]
    # corr [1,NP_p] -> [NP_p,1] via diagonal masked-sum (guaranteed lowering)
    eye = (lax.broadcasted_iota(jnp.int32, (NP_p, NP_p), 0)
           == lax.broadcasted_iota(jnp.int32, (NP_p, NP_p), 1))
    corr_col = jnp.sum(jnp.where(eye, corr, 0.0), axis=1, keepdims=True)     # [NP_p,1]
    accn_s[...] = corr_col * accn_s[...] + delta

    # ---- finalize: per-node normalize + fused FC head (eval-mode BN folded) --
    @pl.when(t == n_tiles - 1)
    def _fin():
        l = l_s[...]
        inv_l = jnp.where(l > 0, 1.0 / l, 0.0)                # exact reciprocal, once
        pooled = jnp.dot(inv_l, accn_s[...], preferred_element_type=f32)   # [1, H]
        slope = f32(0.01)                                     # nn.LeakyReLU default
        h = jnp.dot(pooled, fcw1_ref[...], preferred_element_type=f32) + fcb1_ref[...]
        h = jnp.where(h >= 0, h, slope * h)
        h = h * bn1s_ref[...] + bn1o_ref[...]
        h = jnp.dot(h, fcw2_ref[...], preferred_element_type=f32) + fcb2_ref[...]
        h = jnp.where(h >= 0, h, slope * h)
        h = h * bn2s_ref[...] + bn2o_ref[...]
        out_ref[...] = jnp.dot(h, fcw3_ref[...], preferred_element_type=f32) + fcb3_ref[...]


# -----------------------------------------------------------------------------
# Wrapper: padding to TPU-friendly shapes + pallas_call
# -----------------------------------------------------------------------------
def _round_up(x, m):
    return (x + m - 1) // m * m


def _pad2(x, rows, cols, dtype):
    x = jnp.asarray(x, dtype)
    return jnp.zeros((rows, cols), dtype).at[:x.shape[0], :x.shape[1]].set(x)


@functools.partial(jax.jit, static_argnames=("edge_tile",))
def ligand_pocket_agg_forward(lig, pkt, ef, src_idx, dst_idx, params, *,
                              edge_tile=512):
    # edge_tile: 512 recommended on v6e/v7x, 256 on v5e (sweepable).
    f32, bf16, i32 = jnp.float32, jnp.bfloat16, jnp.int32
    LANE = 128

    NL, FN = lig.shape
    NP, _ = pkt.shape
    E, FE = ef.shape
    H = params["prj_src_w"].shape[1]
    DFC = params["fc_w1"].shape[1]
    NT = params["fc_w3"].shape[1]

    # nodes -> x32 (gather-K), input feats -> x16 (bf16 packing, NOT 128),
    # hidden / FC dims -> x128 (clean lane-boundary slices).
    NL_p = _round_up(NL, 32)
    NP_p = _round_up(NP, 32)
    FN_p = _round_up(FN, 16)
    FE_p = _round_up(FE, 16)
    H_p = _round_up(H, LANE)
    H2_p = 2 * H_p
    DFC_p = _round_up(DFC, LANE)
    OUT_p = LANE                        # lane-dense output slab, col 0 = prediction

    TE = max(8, (edge_tile // 8) * 8)   # sublane-aligned edge tile
    E_p = _round_up(E, TE)
    n_tiles = E_p // TE

    # ---- padded inputs (bf16 operands for the MXU) ---------------------------
    lig_p = _pad2(lig, NL_p, FN_p, bf16)
    pkt_p = _pad2(pkt, NP_p, FN_p, bf16)
    ef_p = _pad2(ef, E_p, FE_p, bf16)

    src_flat = jnp.full((E_p,), -1, i32).at[:E].set(src_idx.astype(i32))
    dst_flat = jnp.full((E_p,), -1, i32).at[:E].set(dst_idx.astype(i32))
    src_col = src_flat.reshape(E_p, 1)                 # column layout (gather one-hots)
    dst_col = dst_flat.reshape(E_p, 1)
    dst_row = dst_flat.reshape(n_tiles, 1, TE)         # lane-dense (scatter one-hot)

    # ---- concatenated projection weights: [prj | w] along the output dim ----
    def cat_w(a, b, rows):
        w = jnp.zeros((rows, H2_p), bf16)
        w = w.at[:a.shape[0], :a.shape[1]].set(a.astype(bf16))
        w = w.at[:b.shape[0], H_p:H_p + b.shape[1]].set(b.astype(bf16))
        return w

    def cat_b(a, b):
        v = jnp.zeros((1, H2_p), f32)
        v = v.at[:, :a.shape[1]].set(a.astype(f32))
        v = v.at[:, H_p:H_p + b.shape[1]].set(b.astype(f32))
        return v

    wl = cat_w(params["prj_src_w"], params["w_src_w"], FN_p)
    bl = cat_b(params["prj_src_b"], params["w_src_b"])
    wp = cat_w(params["prj_dst_w"], params["w_dst_w"], FN_p)
    bp = cat_b(params["prj_dst_b"], params["w_dst_b"])
    we = cat_w(params["prj_edge_w"], params["w_edge_w"], FE_p)
    be = cat_b(params["prj_edge_b"], params["w_edge_b"])

    prelu = params["prelu_alpha"].astype(f32).reshape(1, 1)
    attw = _pad2(params["att_w"].T, 1, H_p, f32)
    attb = params["att_b"].astype(f32).reshape(1, 1)

    # ---- FC head: BN (eval) folded into scale/offset on the host -------------
    eps = 1e-5

    def bn_fold(g, b, m, v):
        s = g.astype(f32) / jnp.sqrt(v.astype(f32) + eps)
        return s, b.astype(f32) - m.astype(f32) * s

    bn1s_u, bn1o_u = bn_fold(params["bn1_g"], params["bn1_b"], params["bn1_m"], params["bn1_v"])
    bn2s_u, bn2o_u = bn_fold(params["bn2_g"], params["bn2_b"], params["bn2_m"], params["bn2_v"])

    fcw1, fcb1 = _pad2(params["fc_w1"], H_p, DFC_p, f32), _pad2(params["fc_b1"], 1, DFC_p, f32)
    fcw2, fcb2 = _pad2(params["fc_w2"], DFC_p, DFC_p, f32), _pad2(params["fc_b2"], 1, DFC_p, f32)
    fcw3, fcb3 = _pad2(params["fc_w3"], DFC_p, OUT_p, f32), _pad2(params["fc_b3"], 1, OUT_p, f32)
    bn1s, bn1o = _pad2(bn1s_u, 1, DFC_p, f32), _pad2(bn1o_u, 1, DFC_p, f32)
    bn2s, bn2o = _pad2(bn2s_u, 1, DFC_p, f32), _pad2(bn2o_u, 1, DFC_p, f32)

    # ---- BlockSpecs ----------------------------------------------------------
    vmem_spec = pl.BlockSpec(memory_space=pltpu.MemorySpace.VMEM)   # whole array, single copy
    smem_spec = pl.BlockSpec(memory_space=pltpu.MemorySpace.SMEM)   # scalars

    edge_col_spec = pl.BlockSpec((TE, 1), lambda i: (i, 0))
    edge_row_spec = pl.BlockSpec((1, 1, TE), lambda i: (i, 0, 0))
    edge_feat_spec = pl.BlockSpec((TE, FE_p), lambda i: (i, 0))

    in_specs = [
        edge_col_spec, edge_col_spec, edge_row_spec, edge_feat_spec,   # streamed per tile
        vmem_spec, vmem_spec,                                          # lig, pkt
        vmem_spec, vmem_spec, vmem_spec, vmem_spec, vmem_spec, vmem_spec,  # wl,bl,wp,bp,we,be
        smem_spec, vmem_spec, smem_spec,                               # prelu, attw, attb
        vmem_spec, vmem_spec, vmem_spec, vmem_spec,                    # fcw1,fcb1,bn1s,bn1o
        vmem_spec, vmem_spec, vmem_spec, vmem_spec,                    # fcw2,fcb2,bn2s,bn2o
        vmem_spec, vmem_spec,                                          # fcw3,fcb3
    ]

    scratch_shapes = [
        pltpu.VMEM((NL_p, H2_p), bf16),    # [prj_src(lig) | w_src(lig)]
        pltpu.VMEM((NP_p, H2_p), bf16),    # [prj_dst(pkt) | w_dst(pkt)]
        pltpu.VMEM((1, NP_p), f32),        # per-node running max
        pltpu.VMEM((1, NP_p), f32),        # per-node softmax denominator
        pltpu.VMEM((NP_p, H_p), f32),      # per-node numerator accumulator
    ]

    out_padded = pl.pallas_call(
        _agg_fc_kernel,
        out_shape=jax.ShapeDtypeStruct((1, OUT_p), f32),
        grid_spec=pltpu.PrefetchScalarGridSpec(
            num_scalar_prefetch=0,
            grid=(n_tiles,),                               # single edge pass
            in_specs=in_specs,
            out_specs=pl.BlockSpec((1, OUT_p), lambda i: (0, 0)),
            scratch_shapes=scratch_shapes,
        ),
        compiler_params=pltpu.CompilerParams(
            dimension_semantics=("arbitrary",),
            vmem_limit_bytes=24 * 1024 * 1024,             # right-sized (few-MiB footprint)
        ),
    )(src_col, dst_col, dst_row, ef_p,
      lig_p, pkt_p,
      wl, bl, wp, bp, we, be,
      prelu, attw, attb,
      fcw1, fcb1, bn1s, bn1o,
      fcw2, fcb2, bn2s, bn2o,
      fcw3, fcb3)

    return out_padded[:, :NT]


# -----------------------------------------------------------------------------
# Pure-JAX f32 reference (mirrors the PyTorch/DGL semantics) for validation
# -----------------------------------------------------------------------------
def reference_forward(lig, pkt, ef, src_idx, dst_idx, params, n_pocket):
    def lin(x, w, b):
        return x @ w + b

    h_lig = lin(lig, params["prj_src_w"], params["prj_src_b"])
    h_pkt = lin(pkt, params["prj_dst_w"], params["prj_dst_b"])
    e_prj = lin(ef, params["prj_edge_w"], params["prj_edge_b"])

    w = h_lig[src_idx] + h_pkt[dst_idx] + e_prj
    alpha = params["prelu_alpha"][0, 0]
    w = jnp.where(w >= 0, w, alpha * w)
    ws = (w @ params["att_w"] + params["att_b"])[:, 0]                # [E]

    # edge softmax grouped by destination node (numerically stable per group)
    m = jnp.full((n_pocket,), -jnp.inf).at[dst_idx].max(ws)
    ex = jnp.exp(ws - m[dst_idx])
    denom = jnp.zeros((n_pocket,)).at[dst_idx].add(ex)
    a = (ex / denom[dst_idx])[:, None]                                # [E,1]

    g_src = lin(lig, params["w_src_w"], params["w_src_b"])[src_idx]
    g_dst = lin(pkt, params["w_dst_w"], params["w_dst_b"])[dst_idx]
    g_e = lin(ef, params["w_edge_w"], params["w_edge_b"])
    l = a * g_e * g_src * g_dst
    s = jnp.sum(l, axis=0, keepdims=True)                             # [1,H]

    eps, slope = 1e-5, 0.01
    h = s @ params["fc_w1"] + params["fc_b1"]
    h = jnp.where(h >= 0, h, slope * h)
    h = (h - params["bn1_m"]) / jnp.sqrt(params["bn1_v"] + eps) * params["bn1_g"] + params["bn1_b"]
    h = h @ params["fc_w2"] + params["fc_b2"]
    h = jnp.where(h >= 0, h, slope * h)
    h = (h - params["bn2_m"]) / jnp.sqrt(params["bn2_v"] + eps) * params["bn2_g"] + params["bn2_b"]
    return h @ params["fc_w3"] + params["fc_b3"]


# -----------------------------------------------------------------------------
# Deterministic parameter construction (synthetic, not a checkpoint)
# -----------------------------------------------------------------------------
def make_params(key, f_node, f_edge, hidden, d_fc=200, n_tasks=1):
    keys = iter(jax.random.split(key, 64))

    def w(shape, scale=0.1):
        return (scale * jax.random.normal(next(keys), shape)).astype(jnp.float32)

    p = {}
    for name, fin in (("prj_src", f_node), ("prj_dst", f_node), ("prj_edge", f_edge),
                      ("w_src", f_node), ("w_dst", f_node), ("w_edge", f_edge)):
        p[f"{name}_w"] = w((fin, hidden))
        p[f"{name}_b"] = w((1, hidden), 0.01)
    p["prelu_alpha"] = jnp.full((1, 1), 0.25, jnp.float32)   # nn.PReLU default
    p["att_w"] = w((hidden, 1))
    p["att_b"] = w((1, 1), 0.01)
    # FC(hidden, 200, 2, dropout=0.1, n_tasks=1)
    p["fc_w1"], p["fc_b1"] = w((hidden, d_fc)), w((1, d_fc), 0.01)
    p["fc_w2"], p["fc_b2"] = w((d_fc, d_fc), 0.05), w((1, d_fc), 0.01)
    p["fc_w3"], p["fc_b3"] = w((d_fc, n_tasks), 0.05), w((1, n_tasks), 0.01)
    for i in (1, 2):
        p[f"bn{i}_g"] = (1.0 + 0.1 * jax.random.normal(next(keys), (1, d_fc))).astype(jnp.float32)
        p[f"bn{i}_b"] = w((1, d_fc), 0.1)
        p[f"bn{i}_m"] = w((1, d_fc), 0.1)
        p[f"bn{i}_v"] = (1.0 + 0.1 * jnp.abs(jax.random.normal(next(keys), (1, d_fc)))).astype(jnp.float32)
    return p


if __name__ == "__main__":
    key = jax.random.PRNGKey(0)
    k_lig, k_pkt, k_edge, k_src, k_dst, k_par = jax.random.split(key, 6)

    # small synthetic bipartite ligand->pocket graph
    NODE_FEAT, EDGE_FEAT, HIDDEN = 20, 12, 32
    N_LIG, N_PKT, N_EDGE = 16, 12, 40

    lig = jax.random.normal(k_lig, (N_LIG, NODE_FEAT), jnp.float32)
    pkt = jax.random.normal(k_pkt, (N_PKT, NODE_FEAT), jnp.float32)
    ef = jax.random.normal(k_edge, (N_EDGE, EDGE_FEAT), jnp.float32)
    src_idx = jax.random.randint(k_src, (N_EDGE,), 0, N_LIG)
    dst_idx = jax.random.randint(k_dst, (N_EDGE,), 0, N_PKT)

    params = make_params(k_par, NODE_FEAT, EDGE_FEAT, HIDDEN)

    # small edge tile so the test exercises the online-softmax rescale across
    # several grid steps (production default is 512 on v6e/v7x, 256 on v5e)
    out = ligand_pocket_agg_forward(lig, pkt, ef, src_idx, dst_idx, params, edge_tile=16)
    out = jax.block_until_ready(out)

    ref = reference_forward(lig, pkt, ef, src_idx, dst_idx, params, N_PKT)
    ref = jax.block_until_ready(ref)

    assert out.shape == (1, 1), out.shape
    # bf16 MXU operands (f32 accumulation) -> slightly looser tolerance vs f32 ref
    assert jnp.allclose(out, ref, rtol=2e-2, atol=2e-2), (out, ref)
    print("KERNEL_OK")
</pallas_src>

<mosaic_0001>
module attributes {stable_mosaic.version = 11 : i64} {
  func.func @_agg_fc_kernel(%arg0: i32, %arg1: memref<16x1xi32, #tpu.memory_space<vmem>>, %arg2: memref<16x1xi32, #tpu.memory_space<vmem>>, %arg3: memref<1x1x16xi32, #tpu.memory_space<vmem>>, %arg4: memref<16x16xbf16, #tpu.memory_space<vmem>>, %arg5: memref<32x32xbf16, #tpu.memory_space<vmem>>, %arg6: memref<32x32xbf16, #tpu.memory_space<vmem>>, %arg7: memref<32x256xbf16, #tpu.memory_space<vmem>>, %arg8: memref<1x256xf32, #tpu.memory_space<vmem>>, %arg9: memref<32x256xbf16, #tpu.memory_space<vmem>>, %arg10: memref<1x256xf32, #tpu.memory_space<vmem>>, %arg11: memref<16x256xbf16, #tpu.memory_space<vmem>>, %arg12: memref<1x256xf32, #tpu.memory_space<vmem>>, %arg13: memref<1x1xf32, #tpu.memory_space<smem>>, %arg14: memref<1x128xf32, #tpu.memory_space<vmem>>, %arg15: memref<1x1xf32, #tpu.memory_space<smem>>, %arg16: memref<128x256xf32, #tpu.memory_space<vmem>>, %arg17: memref<1x256xf32, #tpu.memory_space<vmem>>, %arg18: memref<1x256xf32, #tpu.memory_space<vmem>>, %arg19: memref<1x256xf32, #tpu.memory_space<vmem>>, %arg20: memref<256x256xf32, #tpu.memory_space<vmem>>, %arg21: memref<1x256xf32, #tpu.memory_space<vmem>>, %arg22: memref<1x256xf32, #tpu.memory_space<vmem>>, %arg23: memref<1x256xf32, #tpu.memory_space<vmem>>, %arg24: memref<256x128xf32, #tpu.memory_space<vmem>>, %arg25: memref<1x128xf32, #tpu.memory_space<vmem>>, %arg26: memref<1x128xf32, #tpu.memory_space<vmem>>, %arg27: memref<32x256xbf16, #tpu.memory_space<vmem>>, %arg28: memref<32x256xbf16, #tpu.memory_space<vmem>>, %arg29: memref<1x32xf32, #tpu.memory_space<vmem>>, %arg30: memref<1x32xf32, #tpu.memory_space<vmem>>, %arg31: memref<32x128xf32, #tpu.memory_space<vmem>>) attributes {dimension_semantics = [#tpu.dimension_semantics<arbitrary>], iteration_bounds = array<i64: 3>, scalar_prefetch = 0 : i64, scratch_operands = 5 : i64, tpu.core_type = #tpu.core_type<tc>, window_params = [{transform_indices = @transform_0, window_bounds = array<i64: 16, 1>}, {transform_indices = @transform_1, window_bounds = array<i64: 16, 1>}, {transform_indices = @transform_2, window_bounds = array<i64: 1, 1, 16>}, {transform_indices = @transform_3, window_bounds = array<i64: 16, 16>}, {pipeline_mode = #tpu.pipeline_mode<synchronous>, transform_indices = @transform_4, window_bounds = array<i64: 32, 32>}, {pipeline_mode = #tpu.pipeline_mode<synchronous>, transform_indices = @transform_5, window_bounds = array<i64: 32, 32>}, {pipeline_mode = #tpu.pipeline_mode<synchronous>, transform_indices = @transform_6, window_bounds = array<i64: 32, 256>}, {pipeline_mode = #tpu.pipeline_mode<synchronous>, transform_indices = @transform_7, window_bounds = array<i64: 1, 256>}, {pipeline_mode = #tpu.pipeline_mode<synchronous>, transform_indices = @transform_8, window_bounds = array<i64: 32, 256>}, {pipeline_mode = #tpu.pipeline_mode<synchronous>, transform_indices = @transform_9, window_bounds = array<i64: 1, 256>}, {pipeline_mode = #tpu.pipeline_mode<synchronous>, transform_indices = @transform_10, window_bounds = array<i64: 16, 256>}, {pipeline_mode = #tpu.pipeline_mode<synchronous>, transform_indices = @transform_11, window_bounds = array<i64: 1, 256>}, {transform_indices = @transform_12, window_bounds = array<i64: 1, 1>}, {pipeline_mode = #tpu.pipeline_mode<synchronous>, transform_indices = @transform_13, window_bounds = array<i64: 1, 128>}, {transform_indices = @transform_14, window_bounds = array<i64: 1, 1>}, {pipeline_mode = #tpu.pipeline_mode<synchronous>, transform_indices = @transform_15, window_bounds = array<i64: 128, 256>}, {pipeline_mode = #tpu.pipeline_mode<synchronous>, transform_indices = @transform_16, window_bounds = array<i64: 1, 256>}, {pipeline_mode = #tpu.pipeline_mode<synchronous>, transform_indices = @transform_17, window_bounds = array<i64: 1, 256>}, {pipeline_mode = #tpu.pipeline_mode<synchronous>, transform_indices = @transform_18, window_bounds = array<i64: 1, 256>}, {pipeline_mode = #tpu.pipeline_mode<synchronous>, transform_indices = @transform_19, window_bounds = array<i64: 256, 256>}, {pipeline_mode = #tpu.pipeline_mode<synchronous>, transform_indices = @transform_20, window_bounds = array<i64: 1, 256>}, {pipeline_mode = #tpu.pipeline_mode<synchronous>, transform_indices = @transform_21, window_bounds = array<i64: 1, 256>}, {pipeline_mode = #tpu.pipeline_mode<synchronous>, transform_indices = @transform_22, window_bounds = array<i64: 1, 256>}, {pipeline_mode = #tpu.pipeline_mode<synchronous>, transform_indices = @transform_23, window_bounds = array<i64: 256, 128>}, {pipeline_mode = #tpu.pipeline_mode<synchronous>, transform_indices = @transform_24, window_bounds = array<i64: 1, 128>}, {pipeline_mode = #tpu.pipeline_mode<synchronous>, transform_indices = @transform_25, window_bounds = array<i64: 1, 128>}]} {
    %c0_i32 = arith.constant 0 : i32
    %0 = arith.cmpi eq, %arg0, %c0_i32 : i32
    %1 = arith.extui %0 : i1 to i32
    %cst = arith.constant -1.000000e+30 : f32
    %c0_i32_0 = arith.constant 0 : i32
    %2 = arith.cmpi ne, %1, %c0_i32_0 : i32
    scf.if %2 {
      %c0_52 = arith.constant 0 : index
      %c0_53 = arith.constant 0 : index
      %112 = vector.load %arg5[%c0_52, %c0_53] : memref<32x32xbf16, #tpu.memory_space<vmem>>, vector<32x32xbf16>
      %c0_54 = arith.constant 0 : index
      %c0_55 = arith.constant 0 : index
      %113 = vector.load %arg7[%c0_54, %c0_55] : memref<32x256xbf16, #tpu.memory_space<vmem>>, vector<32x256xbf16>
      %cst_56 = arith.constant dense<0.000000e+00> : vector<32x256xf32>
      %114 = tpu.matmul %112, %113, %cst_56 {dimension_numbers = #tpu.dot_dimension_numbers<[1], [0], [0], [1], [0, 0, 1, 1], [], []>} : vector<32x32xbf16>, vector<32x256xbf16>, vector<32x256xf32> -> vector<32x256xf32>
      %c0_57 = arith.constant 0 : index
      %c0_58 = arith.constant 0 : index
      %115 = vector.load %arg8[%c0_57, %c0_58] : memref<1x256xf32, #tpu.memory_space<vmem>>, vector<1x256xf32>
      %116 = vector.broadcast %115 : vector<1x256xf32> to vector<32x256xf32>
      %117 = arith.addf %114, %116 : vector<32x256xf32>
      %118 = arith.truncf %117 : vector<32x256xf32> to vector<32x256xbf16>
      %c0_59 = arith.constant 0 : index
      %c0_60 = arith.constant 0 : index
      %119 = vector.load %arg27[%c0_59, %c0_60] : memref<32x256xbf16, #tpu.memory_space<vmem>>, vector<32x256xbf16>
      tpu.vector_store %arg27[%c0_59, %c0_60], %118 {strides = array<i32>} : memref<32x256xbf16, #tpu.memory_space<vmem>>, vector<32x256xbf16>,
      %c0_61 = arith.constant 0 : index
      %c0_62 = arith.constant 0 : index
      %120 = vector.load %arg6[%c0_61, %c0_62] : memref<32x32xbf16, #tpu.memory_space<vmem>>, vector<32x32xbf16>
      %c0_63 = arith.constant 0 : index
      %c0_64 = arith.constant 0 : index
      %121 = vector.load %arg9[%c0_63, %c0_64] : memref<32x256xbf16, #tpu.memory_space<vmem>>, vector<32x256xbf16>
      %cst_65 = arith.constant dense<0.000000e+00> : vector<32x256xf32>
      %122 = tpu.matmul %120, %121, %cst_65 {dimension_numbers = #tpu.dot_dimension_numbers<[1], [0], [0], [1], [0, 0, 1, 1], [], []>} : vector<32x32xbf16>, vector<32x256xbf16>, vector<32x256xf32> -> vector<32x256xf32>
      %c0_66 = arith.constant 0 : index
      %c0_67 = arith.constant 0 : index
      %123 = vector.load %arg10[%c0_66, %c0_67] : memref<1x256xf32, #tpu.memory_space<vmem>>, vector<1x256xf32>
      %124 = vector.broadcast %123 : vector<1x256xf32> to vector<32x256xf32>
      %125 = arith.addf %122, %124 : vector<32x256xf32>
      %126 = arith.truncf %125 : vector<32x256xf32> to vector<32x256xbf16>
      %c0_68 = arith.constant 0 : index
      %c0_69 = arith.constant 0 : index
      %127 = vector.load %arg28[%c0_68, %c0_69] : memref<32x256xbf16, #tpu.memory_space<vmem>>, vector<32x256xbf16>
      tpu.vector_store %arg28[%c0_68, %c0_69], %126 {strides = array<i32>} : memref<32x256xbf16, #tpu.memory_space<vmem>>, vector<32x256xbf16>,
      %128 = vector.broadcast %cst : f32 to vector<1x32xf32>
      %c0_70 = arith.constant 0 : index
      %c0_71 = arith.constant 0 : index
      %129 = vector.load %arg29[%c0_70, %c0_71] : memref<1x32xf32, #tpu.memory_space<vmem>>, vector<1x32xf32>
      tpu.vector_store %arg29[%c0_70, %c0_71], %128 {strides = array<i32>} : memref<1x32xf32, #tpu.memory_space<vmem>>, vector<1x32xf32>,
      %cst_72 = arith.constant 0.000000e+00 : f32
      %130 = vector.broadcast %cst_72 : f32 to vector<1x32xf32>
      %c0_73 = arith.constant 0 : index
      %c0_74 = arith.constant 0 : index
      %131 = vector.load %arg30[%c0_73, %c0_74] : memref<1x32xf32, #tpu.memory_space<vmem>>, vector<1x32xf32>
      tpu.vector_store %arg30[%c0_73, %c0_74], %130 {strides = array<i32>} : memref<1x32xf32, #tpu.memory_space<vmem>>, vector<1x32xf32>,
      %cst_75 = arith.constant 0.000000e+00 : f32
      %132 = vector.broadcast %cst_75 : f32 to vector<32x128xf32>
      %c0_76 = arith.constant 0 : index
      %c0_77 = arith.constant 0 : index
      %133 = vector.load %arg31[%c0_76, %c0_77] : memref<32x128xf32, #tpu.memory_space<vmem>>, vector<32x128xf32>
      tpu.vector_store %arg31[%c0_76, %c0_77], %132 {strides = array<i32>} : memref<32x128xf32, #tpu.memory_space<vmem>>, vector<32x128xf32>,
      %cst_78 = arith.constant 0.000000e+00 : f32
      %134 = vector.broadcast %cst_78 : f32 to vector<1x128xf32>
      %c0_79 = arith.constant 0 : index
      %c0_80 = arith.constant 0 : index
      %135 = vector.load %arg26[%c0_79, %c0_80] : memref<1x128xf32, #tpu.memory_space<vmem>>, vector<1x128xf32>
      tpu.vector_store %arg26[%c0_79, %c0_80], %134 {strides = array<i32>} : memref<1x128xf32, #tpu.memory_space<vmem>>, vector<1x128xf32>,
    } else {
    }
    %c0 = arith.constant 0 : index
    %c0_1 = arith.constant 0 : index
    %3 = vector.load %arg1[%c0, %c0_1] : memref<16x1xi32, #tpu.memory_space<vmem>>, vector<16x1xi32>
    %c0_2 = arith.constant 0 : index
    %c0_3 = arith.constant 0 : index
    %4 = vector.load %arg2[%c0_2, %c0_3] : memref<16x1xi32, #tpu.memory_space<vmem>>, vector<16x1xi32>
    %c0_4 = arith.constant 0 : index
    %c0_5 = arith.constant 0 : index
    %c0_6 = arith.constant 0 : index
    %5 = vector.load %arg3[%c0_4, %c0_5, %c0_6] : memref<1x1x16xi32, #tpu.memory_space<vmem>>, vector<1x1x16xi32>
    %6 = vector.shape_cast %5 : vector<1x1x16xi32> to vector<1x16xi32>
    %7 = tpu.iota {dimensions = array<i32: 1>} : vector<16x32xi32>
    %8 = vector.broadcast %3 : vector<16x1xi32> to vector<16x32xi32>
    %9 = arith.cmpi eq, %7, %8 : vector<16x32xi32>
    %10 = arith.extui %9 : vector<16x32xi1> to vector<16x32xi32>
    %11 = arith.sitofp %10 : vector<16x32xi32> to vector<16x32xf32>
    %12 = arith.truncf %11 : vector<16x32xf32> to vector<16x32xbf16>
    %13 = vector.broadcast %4 : vector<16x1xi32> to vector<16x32xi32>
    %14 = arith.cmpi eq, %7, %13 : vector<16x32xi32>
    %15 = arith.extui %14 : vector<16x32xi1> to vector<16x32xi32>
    %16 = arith.sitofp %15 : vector<16x32xi32> to vector<16x32xf32>
    %17 = arith.truncf %16 : vector<16x32xf32> to vector<16x32xbf16>
    %18 = tpu.iota {dimensions = array<i32: 0>} : vector<32x16xi32>
    %19 = vector.broadcast %6 : vector<1x16xi32> to vector<32x16xi32>
    %20 = arith.cmpi eq, %18, %19 : vector<32x16xi32>
    %21 = arith.extui %20 : vector<32x16xi1> to vector<32x16xi32>
    %22 = arith.sitofp %21 : vector<32x16xi32> to vector<32x16xf32>
    %23 = arith.truncf %22 : vector<32x16xf32> to vector<32x16xbf16>
    %c0_7 = arith.constant 0 : index
    %c0_8 = arith.constant 0 : index
    %24 = vector.load %arg4[%c0_7, %c0_8] : memref<16x16xbf16, #tpu.memory_space<vmem>>, vector<16x16xbf16>
    %c0_9 = arith.constant 0 : index
    %c0_10 = arith.constant 0 : index
    %25 = vector.load %arg11[%c0_9, %c0_10] : memref<16x256xbf16, #tpu.memory_space<vmem>>, vector<16x256xbf16>
    %cst_11 = arith.constant dense<0.000000e+00> : vector<16x256xf32>
    %26 = tpu.matmul %24, %25, %cst_11 {dimension_numbers = #tpu.dot_dimension_numbers<[1], [0], [0], [1], [0, 0, 1, 1], [], []>} : vector<16x16xbf16>, vector<16x256xbf16>, vector<16x256xf32> -> vector<16x256xf32>
    %c0_12 = arith.constant 0 : index
    %c0_13 = arith.constant 0 : index
    %27 = vector.load %arg12[%c0_12, %c0_13] : memref<1x256xf32, #tpu.memory_space<vmem>>, vector<1x256xf32>
    %28 = vector.broadcast %27 : vector<1x256xf32> to vector<16x256xf32>
    %29 = arith.addf %26, %28 : vector<16x256xf32>
    %c0_14 = arith.constant 0 : index
    %c0_15 = arith.constant 0 : index
    %30 = vector.load %arg27[%c0_14, %c0_15] : memref<32x256xbf16, #tpu.memory_space<vmem>>, vector<32x256xbf16>
    %cst_16 = arith.constant dense<0.000000e+00> : vector<16x256xf32>
    %31 = tpu.matmul %12, %30, %cst_16 {dimension_numbers = #tpu.dot_dimension_numbers<[1], [0], [0], [1], [0, 0, 1, 1], [], []>} : vector<16x32xbf16>, vector<32x256xbf16>, vector<16x256xf32> -> vector<16x256xf32>
    %c0_17 = arith.constant 0 : index
    %c0_18 = arith.constant 0 : index
    %32 = vector.load %arg28[%c0_17, %c0_18] : memref<32x256xbf16, #tpu.memory_space<vmem>>, vector<32x256xbf16>
    %cst_19 = arith.constant dense<0.000000e+00> : vector<16x256xf32>
    %33 = tpu.matmul %17, %32, %cst_19 {dimension_numbers = #tpu.dot_dimension_numbers<[1], [0], [0], [1], [0, 0, 1, 1], [], []>} : vector<16x32xbf16>, vector<32x256xbf16>, vector<16x256xf32> -> vector<16x256xf32>
    %34 = vector.extract_strided_slice %31 {offsets = [0, 0], sizes = [16, 128], strides = [1, 1]} : vector<16x256xf32> to vector<16x128xf32>
    %35 = vector.extract_strided_slice %33 {offsets = [0, 0], sizes = [16, 128], strides = [1, 1]} : vector<16x256xf32> to vector<16x128xf32>
    %36 = arith.addf %34, %35 : vector<16x128xf32>
    %37 = vector.extract_strided_slice %29 {offsets = [0, 0], sizes = [16, 128], strides = [1, 1]} : vector<16x256xf32> to vector<16x128xf32>
    %38 = arith.addf %36, %37 : vector<16x128xf32>
    %c0_20 = arith.constant 0 : index
    %c0_21 = arith.constant 0 : index
    %39 = memref.load %arg13[%c0_20, %c0_21] : memref<1x1xf32, #tpu.memory_space<smem>>
    %cst_22 = arith.constant 0.000000e+00 : f32
    %40 = vector.broadcast %cst_22 : f32 to vector<16x128xf32>
    %41 = arith.cmpf oge, %38, %40 : vector<16x128xf32>
    %42 = vector.broadcast %39 : f32 to vector<16x128xf32>
    %43 = arith.mulf %42, %38 : vector<16x128xf32>
    %44 = arith.select %41, %38, %43 : vector<16x128xi1>, vector<16x128xf32>
    %c0_23 = arith.constant 0 : index
    %c0_24 = arith.constant 0 : index
    %45 = vector.load %arg14[%c0_23, %c0_24] : memref<1x128xf32, #tpu.memory_space<vmem>>, vector<1x128xf32>
    %46 = vector.broadcast %45 : vector<1x128xf32> to vector<16x128xf32>
    %47 = arith.mulf %44, %46 : vector<16x128xf32>
    %cst_25 = arith.constant dense<0.000000e+00> : vector<16xf32>
    %48 = vector.multi_reduction <add>, %47, %cst_25 [1] : vector<16x128xf32> to vector<16xf32>
    %49 = vector.shape_cast %48 : vector<16xf32> to vector<16x1xf32>
    %c0_26 = arith.constant 0 : index
    %c0_27 = arith.constant 0 : index
    %50 = memref.load %arg15[%c0_26, %c0_27] : memref<1x1xf32, #tpu.memory_space<smem>>
    %51 = vector.broadcast %50 : f32 to vector<16x1xf32>
    %52 = arith.addf %49, %51 : vector<16x1xf32>
    %cst_28 = arith.constant -1.000000e+30 : f32
    %53 = vector.shape_cast %52 : vector<16x1xf32> to vector<16x1xf32>
    %54 = vector.broadcast %53 : vector<16x1xf32> to vector<16x32xf32>
    %55 = vector.broadcast %cst_28 : f32 to vector<16x32xf32>
    %56 = arith.select %14, %54, %55 : vector<16x32xi1>, vector<16x32xf32>
    %cst_29 = arith.constant dense<0xFF800000> : vector<32xf32>
    %57 = vector.multi_reduction <maximumf>, %56, %cst_29 [0] : vector<16x32xf32> to vector<32xf32>
    %58 = vector.shape_cast %57 : vector<32xf32> to vector<1x32xf32>
    %c0_30 = arith.constant 0 : index
    %c0_31 = arith.constant 0 : index
    %59 = vector.load %arg29[%c0_30, %c0_31] : memref<1x32xf32, #tpu.memory_space<vmem>>, vector<1x32xf32>
    %60 = arith.maximumf %59, %58 : vector<1x32xf32>
    %61 = arith.subf %59, %60 : vector<1x32xf32>
    %62 = math.exp %61 : vector<1x32xf32>
    %cst_32 = arith.constant 0.000000e+00 : f32
    %63 = vector.shape_cast %60 : vector<1x32xf32> to vector<1x32xf32>
    %64 = vector.broadcast %63 : vector<1x32xf32> to vector<16x32xf32>
    %65 = vector.broadcast %cst_32 : f32 to vector<16x32xf32>
    %66 = arith.select %14, %64, %65 : vector<16x32xi1>, vector<16x32xf32>
    %cst_33 = arith.constant dense<0.000000e+00> : vector<16xf32>
    %67 = vector.multi_reduction <add>, %66, %cst_33 [1] : vector<16x32xf32> to vector<16xf32>
    %68 = vector.shape_cast %67 : vector<16xf32> to vector<16x1xf32>
    %c0_i32_34 = arith.constant 0 : i32
    %69 = vector.broadcast %c0_i32_34 : i32 to vector<16x1xi32>
    %70 = arith.cmpi sge, %4, %69 : vector<16x1xi32>
    %71 = arith.subf %52, %68 : vector<16x1xf32>
    %72 = math.exp %71 : vector<16x1xf32>
    %cst_35 = arith.constant 0.000000e+00 : f32
    %73 = vector.broadcast %cst_35 : f32 to vector<16x1xf32>
    %74 = arith.select %70, %72, %73 : vector<16x1xi1>, vector<16x1xf32>
    %c0_36 = arith.constant 0 : index
    %c0_37 = arith.constant 0 : index
    %75 = vector.load %arg30[%c0_36, %c0_37] : memref<1x32xf32, #tpu.memory_space<vmem>>, vector<1x32xf32>
    %76 = arith.mulf %62, %75 : vector<1x32xf32>
    %cst_38 = arith.constant 0.000000e+00 : f32
    %77 = vector.shape_cast %74 : vector<16x1xf32> to vector<16x1xf32>
    %78 = vector.broadcast %77 : vector<16x1xf32> to vector<16x32xf32>
    %79 = vector.broadcast %cst_38 : f32 to vector<16x32xf32>
    %80 = arith.select %14, %78, %79 : vector<16x32xi1>, vector<16x32xf32>
    %cst_39 = arith.constant dense<0.000000e+00> : vector<32xf32>
    %81 = vector.multi_reduction <add>, %80, %cst_39 [0] : vector<16x32xf32> to vector<32xf32>
    %82 = vector.shape_cast %81 : vector<32xf32> to vector<1x32xf32>
    %83 = arith.addf %76, %82 : vector<1x32xf32>
    %c0_40 = arith.constant 0 : index
    %c0_41 = arith.constant 0 : index
    %84 = vector.load %arg30[%c0_40, %c0_41] : memref<1x32xf32, #tpu.memory_space<vmem>>, vector<1x32xf32>
    tpu.vector_store %arg30[%c0_40, %c0_41], %83 {strides = array<i32>} : memref<1x32xf32, #tpu.memory_space<vmem>>, vector<1x32xf32>,
    %c0_42 = arith.constant 0 : index
    %c0_43 = arith.constant 0 : index
    %85 = vector.load %arg29[%c0_42, %c0_43] : memref<1x32xf32, #tpu.memory_space<vmem>>, vector<1x32xf32>
    tpu.vector_store %arg29[%c0_42, %c0_43], %60 {strides = array<i32>} : memref<1x32xf32, #tpu.memory_space<vmem>>, vector<1x32xf32>,
    %86 = vector.extract_strided_slice %29 {offsets = [0, 128], sizes = [16, 128], strides = [1, 1]} : vector<16x256xf32> to vector<16x128xf32>
    %87 = vector.broadcast %74 : vector<16x1xf32> to vector<16x128xf32>
    %88 = arith.mulf %87, %86 : vector<16x128xf32>
    %89 = vector.extract_strided_slice %31 {offsets = [0, 128], sizes = [16, 128], strides = [1, 1]} : vector<16x256xf32> to vector<16x128xf32>
    %90 = arith.mulf %88, %89 : vector<16x128xf32>
    %91 = vector.extract_strided_slice %33 {offsets = [0, 128], sizes = [16, 128], strides = [1, 1]} : vector<16x256xf32> to vector<16x128xf32>
    %92 = arith.mulf %90, %91 : vector<16x128xf32>
    %93 = arith.truncf %92 : vector<16x128xf32> to vector<16x128xbf16>
    %cst_44 = arith.constant dense<0.000000e+00> : vector<32x128xf32>
    %94 = tpu.matmul %23, %93, %cst_44 {dimension_numbers = #tpu.dot_dimension_numbers<[1], [0], [0], [1], [0, 0, 1, 1], [], []>} : vector<32x16xbf16>, vector<16x128xbf16>, vector<32x128xf32> -> vector<32x128xf32>
    %95 = tpu.iota {dimensions = array<i32: 0>} : vector<32x32xi32>
    %96 = tpu.iota {dimensions = array<i32: 1>} : vector<32x32xi32>
    %97 = arith.cmpi eq, %95, %96 : vector<32x32xi32>
    %cst_45 = arith.constant 0.000000e+00 : f32
    %98 = vector.shape_cast %62 : vector<1x32xf32> to vector<1x32xf32>
    %99 = vector.broadcast %98 : vector<1x32xf32> to vector<32x32xf32>
    %100 = vector.broadcast %cst_45 : f32 to vector<32x32xf32>
    %101 = arith.select %97, %99, %100 : vector<32x32xi1>, vector<32x32xf32>
    %cst_46 = arith.constant dense<0.000000e+00> : vector<32xf32>
    %102 = vector.multi_reduction <add>, %101, %cst_46 [1] : vector<32x32xf32> to vector<32xf32>
    %103 = vector.shape_cast %102 : vector<32xf32> to vector<32x1xf32>
    %c0_47 = arith.constant 0 : index
    %c0_48 = arith.constant 0 : index
    %104 = vector.load %arg31[%c0_47, %c0_48] : memref<32x128xf32, #tpu.memory_space<vmem>>, vector<32x128xf32>
    %105 = vector.broadcast %103 : vector<32x1xf32> to vector<32x128xf32>
    %106 = arith.mulf %105, %104 : vector<32x128xf32>
    %107 = arith.addf %106, %94 : vector<32x128xf32>
    %c0_49 = arith.constant 0 : index
    %c0_50 = arith.constant 0 : index
    %108 = vector.load %arg31[%c0_49, %c0_50] : memref<32x128xf32, #tpu.memory_space<vmem>>, vector<32x128xf32>
    tpu.vector_store %arg31[%c0_49, %c0_50], %107 {strides = array<i32>} : memref<32x128xf32, #tpu.memory_space<vmem>>, vector<32x128xf32>,
    %c2_i32 = arith.constant 2 : i32
    %109 = arith.cmpi eq, %arg0, %c2_i32 : i32
    %110 = arith.extui %109 : i1 to i32
    %c0_i32_51 = arith.constant 0 : i32
    %111 = arith.cmpi ne, %110, %c0_i32_51 : i32
    scf.if %111 {
      %c0_52 = arith.constant 0 : index
      %c0_53 = arith.constant 0 : index
      %112 = vector.load %arg30[%c0_52, %c0_53] : memref<1x32xf32, #tpu.memory_space<vmem>>, vector<1x32xf32>
      %cst_54 = arith.constant 0.000000e+00 : f32
      %113 = vector.broadcast %cst_54 : f32 to vector<1x32xf32>
      %114 = arith.cmpf ogt, %112, %113 : vector<1x32xf32>
      %cst_55 = arith.constant 1.000000e+00 : f32
      %115 = vector.broadcast %cst_55 : f32 to vector<1x32xf32>
      %116 = arith.divf %115, %112 : vector<1x32xf32>
      %cst_56 = arith.constant 0.000000e+00 : f32
      %117 = vector.broadcast %cst_56 : f32 to vector<1x32xf32>
      %118 = arith.select %114, %116, %117 : vector<1x32xi1>, vector<1x32xf32>
      %c0_57 = arith.constant 0 : index
      %c0_58 = arith.constant 0 : index
      %119 = vector.load %arg31[%c0_57, %c0_58] : memref<32x128xf32, #tpu.memory_space<vmem>>, vector<32x128xf32>
      %cst_59 = arith.constant dense<0.000000e+00> : vector<1x128xf32>
      %120 = tpu.matmul %118, %119, %cst_59 {dimension_numbers = #tpu.dot_dimension_numbers<[1], [0], [0], [1], [0, 0, 1, 1], [], []>} : vector<1x32xf32>, vector<32x128xf32>, vector<1x128xf32> -> vector<1x128xf32>
      %c0_60 = arith.constant 0 : index
      %c0_61 = arith.constant 0 : index
      %121 = vector.load %arg16[%c0_60, %c0_61] : memref<128x256xf32, #tpu.memory_space<vmem>>, vector<128x256xf32>
      %cst_62 = arith.constant dense<0.000000e+00> : vector<1x256xf32>
      %122 = tpu.matmul %120, %121, %cst_62 {dimension_numbers = #tpu.dot_dimension_numbers<[1], [0], [0], [1], [0, 0, 1, 1], [], []>} : vector<1x128xf32>, vector<128x256xf32>, vector<1x256xf32> -> vector<1x256xf32>
      %c0_63 = arith.constant 0 : index
      %c0_64 = arith.constant 0 : index
      %123 = vector.load %arg17[%c0_63, %c0_64] : memref<1x256xf32, #tpu.memory_space<vmem>>, vector<1x256xf32>
      %124 = arith.addf %122, %123 : vector<1x256xf32>
      %cst_65 = arith.constant 0.000000e+00 : f32
      %125 = vector.broadcast %cst_65 : f32 to vector<1x256xf32>
      %126 = arith.cmpf oge, %124, %125 : vector<1x256xf32>
      %cst_66 = arith.constant 0.00999999977 : f32
      %127 = vector.broadcast %cst_66 : f32 to vector<1x256xf32>
      %128 = arith.mulf %127, %124 : vector<1x256xf32>
      %129 = arith.select %126, %124, %128 : vector<1x256xi1>, vector<1x256xf32>
      %c0_67 = arith.constant 0 : index
      %c0_68 = arith.constant 0 : index
      %130 = vector.load %arg18[%c0_67, %c0_68] : memref<1x256xf32, #tpu.memory_space<vmem>>, vector<1x256xf32>
      %131 = arith.mulf %129, %130 : vector<1x256xf32>
      %c0_69 = arith.constant 0 : index
      %c0_70 = arith.constant 0 : index
      %132 = vector.load %arg19[%c0_69, %c0_70] : memref<1x256xf32, #tpu.memory_space<vmem>>, vector<1x256xf32>
      %133 = arith.addf %131, %132 : vector<1x256xf32>
      %c0_71 = arith.constant 0 : index
      %c0_72 = arith.constant 0 : index
      %134 = vector.load %arg20[%c0_71, %c0_72] : memref<256x256xf32, #tpu.memory_space<vmem>>, vector<256x256xf32>
      %cst_73 = arith.constant dense<0.000000e+00> : vector<1x256xf32>
      %135 = tpu.matmul %133, %134, %cst_73 {dimension_numbers = #tpu.dot_dimension_numbers<[1], [0], [0], [1], [0, 0, 1, 1], [], []>} : vector<1x256xf32>, vector<256x256xf32>, vector<1x256xf32> -> vector<1x256xf32>
      %c0_74 = arith.constant 0 : index
      %c0_75 = arith.constant 0 : index
      %136 = vector.load %arg21[%c0_74, %c0_75] : memref<1x256xf32, #tpu.memory_space<vmem>>, vector<1x256xf32>
      %137 = arith.addf %135, %136 : vector<1x256xf32>
      %cst_76 = arith.constant 0.000000e+00 : f32
      %138 = vector.broadcast %cst_76 : f32 to vector<1x256xf32>
      %139 = arith.cmpf oge, %137, %138 : vector<1x256xf32>
      %cst_77 = arith.constant 0.00999999977 : f32
      %140 = vector.broadcast %cst_77 : f32 to vector<1x256xf32>
      %141 = arith.mulf %140, %137 : vector<1x256xf32>
      %142 = arith.select %139, %137, %141 : vector<1x256xi1>, vector<1x256xf32>
      %c0_78 = arith.constant 0 : index
      %c0_79 = arith.constant 0 : index
      %143 = vector.load %arg22[%c0_78, %c0_79] : memref<1x256xf32, #tpu.memory_space<vmem>>, vector<1x256xf32>
      %144 = arith.mulf %142, %143 : vector<1x256xf32>
      %c0_80 = arith.constant 0 : index
      %c0_81 = arith.constant 0 : index
      %145 = vector.load %arg23[%c0_80, %c0_81] : memref<1x256xf32, #tpu.memory_space<vmem>>, vector<1x256xf32>
      %146 = arith.addf %144, %145 : vector<1x256xf32>
      %c0_82 = arith.constant 0 : index
      %c0_83 = arith.constant 0 : index
      %147 = vector.load %arg24[%c0_82, %c0_83] : memref<256x128xf32, #tpu.memory_space<vmem>>, vector<256x128xf32>
      %cst_84 = arith.constant dense<0.000000e+00> : vector<1x128xf32>
      %148 = tpu.matmul %146, %147, %cst_84 {dimension_numbers = #tpu.dot_dimension_numbers<[1], [0], [0], [1], [0, 0, 1, 1], [], []>} : vector<1x256xf32>, vector<256x128xf32>, vector<1x128xf32> -> vector<1x128xf32>
      %c0_85 = arith.constant 0 : index
      %c0_86 = arith.constant 0 : index
      %149 = vector.load %arg25[%c0_85, %c0_86] : memref<1x128xf32, #tpu.memory_space<vmem>>, vector<1x128xf32>
      %150 = arith.addf %148, %149 : vector<1x128xf32>
      %c0_87 = arith.constant 0 : index
      %c0_88 = arith.constant 0 : index
      %151 = vector.load %arg26[%c0_87, %c0_88] : memref<1x128xf32, #tpu.memory_space<vmem>>, vector<1x128xf32>
      tpu.vector_store %arg26[%c0_87, %c0_88], %150 {strides = array<i32>} : memref<1x128xf32, #tpu.memory_space<vmem>>, vector<1x128xf32>,
    } else {
    }
    return
  }
  func.func @transform_0(%arg0: i32) -> (i32, i32) {
    %c0_i32 = arith.constant 0 : i32
    %c0_i32_0 = arith.constant 0 : i32
    return %arg0, %c0_i32 : i32, i32
  }
  func.func @transform_1(%arg0: i32) -> (i32, i32) {
    %c0_i32 = arith.constant 0 : i32
    %c0_i32_0 = arith.constant 0 : i32
    return %arg0, %c0_i32 : i32, i32
  }
  func.func @transform_2(%arg0: i32) -> (i32, i32, i32) {
    %c0_i32 = arith.constant 0 : i32
    %c0_i32_0 = arith.constant 0 : i32
    %c0_i32_1 = arith.constant 0 : i32
    return %arg0, %c0_i32, %c0_i32_0 : i32, i32, i32
  }
  func.func @transform_3(%arg0: i32) -> (i32, i32) {
    %c0_i32 = arith.constant 0 : i32
    %c0_i32_0 = arith.constant 0 : i32
    return %arg0, %c0_i32 : i32, i32
  }
  func.func @transform_4(%arg0: i32) -> (i32, i32) {
    %c0_i32 = arith.constant 0 : i32
    %c0_i32_0 = arith.constant 0 : i32
    %c0_i32_1 = arith.constant 0 : i32
    return %c0_i32, %c0_i32_0 : i32, i32
  }
  func.func @transform_5(%arg0: i32) -> (i32, i32) {
    %c0_i32 = arith.constant 0 : i32
    %c0_i32_0 = arith.constant 0 : i32
    %c0_i32_1 = arith.constant 0 : i32
    return %c0_i32, %c0_i32_0 : i32, i32
  }
  func.func @transform_6(%arg0: i32) -> (i32, i32) {
    %c0_i32 = arith.constant 0 : i32
    %c0_i32_0 = arith.constant 0 : i32
    %c0_i32_1 = arith.constant 0 : i32
    return %c0_i32, %c0_i32_0 : i32, i32
  }
  func.func @transform_7(%arg0: i32) -> (i32, i32) {
    %c0_i32 = arith.constant 0 : i32
    %c0_i32_0 = arith.constant 0 : i32
    %c0_i32_1 = arith.constant 0 : i32
    return %c0_i32, %c0_i32_0 : i32, i32
  }
  func.func @transform_8(%arg0: i32) -> (i32, i32) {
    %c0_i32 = arith.constant 0 : i32
    %c0_i32_0 = arith.constant 0 : i32
    %c0_i32_1 = arith.constant 0 : i32
    return %c0_i32, %c0_i32_0 : i32, i32
  }
  func.func @transform_9(%arg0: i32) -> (i32, i32) {
    %c0_i32 = arith.constant 0 : i32
    %c0_i32_0 = arith.constant 0 : i32
    %c0_i32_1 = arith.constant 0 : i32
    return %c0_i32, %c0_i32_0 : i32, i32
  }
  func.func @transform_10(%arg0: i32) -> (i32, i32) {
    %c0_i32 = arith.constant 0 : i32
    %c0_i32_0 = arith.constant 0 : i32
    %c0_i32_1 = arith.constant 0 : i32
    return %c0_i32, %c0_i32_0 : i32, i32
  }
  func.func @transform_11(%arg0: i32) -> (i32, i32) {
    %c0_i32 = arith.constant 0 : i32
    %c0_i32_0 = arith.constant 0 : i32
    %c0_i32_1 = arith.constant 0 : i32
    return %c0_i32, %c0_i32_0 : i32, i32
  }
  func.func @transform_12(%arg0: i32) -> (i32, i32) {
    %c0_i32 = arith.constant 0 : i32
    %c0_i32_0 = arith.constant 0 : i32
    %c0_i32_1 = arith.constant 0 : i32
    return %c0_i32, %c0_i32_0 : i32, i32
  }
  func.func @transform_13(%arg0: i32) -> (i32, i32) {
    %c0_i32 = arith.constant 0 : i32
    %c0_i32_0 = arith.constant 0 : i32
    %c0_i32_1 = arith.constant 0 : i32
    return %c0_i32, %c0_i32_0 : i32, i32
  }
  func.func @transform_14(%arg0: i32) -> (i32, i32) {
    %c0_i32 = arith.constant 0 : i32
    %c0_i32_0 = arith.constant 0 : i32
    %c0_i32_1 = arith.constant 0 : i32
    return %c0_i32, %c0_i32_0 : i32, i32
  }
  func.func @transform_15(%arg0: i32) -> (i32, i32) {
    %c0_i32 = arith.constant 0 : i32
    %c0_i32_0 = arith.constant 0 : i32
    %c0_i32_1 = arith.constant 0 : i32
    return %c0_i32, %c0_i32_0 : i32, i32
  }
  func.func @transform_16(%arg0: i32) -> (i32, i32) {
    %c0_i32 = arith.constant 0 : i32
    %c0_i32_0 = arith.constant 0 : i32
    %c0_i32_1 = arith.constant 0 : i32
    return %c0_i32, %c0_i32_0 : i32, i32
  }
  func.func @transform_17(%arg0: i32) -> (i32, i32) {
    %c0_i32 = arith.constant 0 : i32
    %c0_i32_0 = arith.constant 0 : i32
    %c0_i32_1 = arith.constant 0 : i32
    return %c0_i32, %c0_i32_0 : i32, i32
  }
  func.func @transform_18(%arg0: i32) -> (i32, i32) {
    %c0_i32 = arith.constant 0 : i32
    %c0_i32_0 = arith.constant 0 : i32
    %c0_i32_1 = arith.constant 0 : i32
    return %c0_i32, %c0_i32_0 : i32, i32
  }
  func.func @transform_19(%arg0: i32) -> (i32, i32) {
    %c0_i32 = arith.constant 0 : i32
    %c0_i32_0 = arith.constant 0 : i32
    %c0_i32_1 = arith.constant 0 : i32
    return %c0_i32, %c0_i32_0 : i32, i32
  }
  func.func @transform_20(%arg0: i32) -> (i32, i32) {
    %c0_i32 = arith.constant 0 : i32
    %c0_i32_0 = arith.constant 0 : i32
    %c0_i32_1 = arith.constant 0 : i32
    return %c0_i32, %c0_i32_0 : i32, i32
  }
  func.func @transform_21(%arg0: i32) -> (i32, i32) {
    %c0_i32 = arith.constant 0 : i32
    %c0_i32_0 = arith.constant 0 : i32
    %c0_i32_1 = arith.constant 0 : i32
    return %c0_i32, %c0_i32_0 : i32, i32
  }
  func.func @transform_22(%arg0: i32) -> (i32, i32) {
    %c0_i32 = arith.constant 0 : i32
    %c0_i32_0 = arith.constant 0 : i32
    %c0_i32_1 = arith.constant 0 : i32
    return %c0_i32, %c0_i32_0 : i32, i32
  }
  func.func @transform_23(%arg0: i32) -> (i32, i32) {
    %c0_i32 = arith.constant 0 : i32
    %c0_i32_0 = arith.constant 0 : i32
    %c0_i32_1 = arith.constant 0 : i32
    return %c0_i32, %c0_i32_0 : i32, i32
  }
  func.func @transform_24(%arg0: i32) -> (i32, i32) {
    %c0_i32 = arith.constant 0 : i32
    %c0_i32_0 = arith.constant 0 : i32
    %c0_i32_1 = arith.constant 0 : i32
    return %c0_i32, %c0_i32_0 : i32, i32
  }
  func.func @transform_25(%arg0: i32) -> (i32, i32) {
    %c0_i32 = arith.constant 0 : i32
    %c0_i32_0 = arith.constant 0 : i32
    %c0_i32_1 = arith.constant 0 : i32
    return %c0_i32, %c0_i32_0 : i32, i32
  }
}

</mosaic_0001>

<bundles_post_ra>
// kernel: ligand_pocket_agg_forward.1
= control target key start
LH: loop header
LB: loop body
LE: loop exit
PB: predicated region body
PF: predicated region fallthrough
CT: control target
= control target key end

     0   :  { %s2894_s0 = inlined_call_operand.vmem [shape: s32[48,1], index: 0, kind: input, shape index: {}]   ;;  %s2895_s1 = inlined_call_operand.vmem [shape: s32[48,1], index: 1, kind: input, shape index: {}]   ;;  %s2896_s2 = inlined_call_operand.vmem [shape: s32[3,1,16], index: 2, kind: input, shape index: {}]   ;;  %s2897_s3 = inlined_call_operand.vmem [shape: bf16[48,16], index: 3, kind: input, shape index: {}]   ;;  %s2898_s4 = inlined_call_operand.vmem [shape: bf16[32,32], index: 4, kind: input, shape index: {}]   ;;  %s2899_s5 = inlined_call_operand.vmem [shape: bf16[32,32], index: 5, kind: input, shape index: {}]   ;;  %s2900_s6 = inlined_call_operand.vmem [shape: bf16[32,256], index: 6, kind: input, shape index: {}]   ;;  %s2901_s7 = inlined_call_operand.vmem [shape: f32[1,256], index: 7, kind: input, shape index: {}]   ;;  %s2902_s8 = inlined_call_operand.vmem [shape: bf16[32,256], index: 8, kind: input, shape index: {}]   ;;  %s2903_s9 = inlined_call_operand.vmem [shape: f32[1,256], index: 9, kind: input, shape index: {}]   ;;  %s2904_s10 = inlined_call_operand.vmem [shape: bf16[16,256], index: 10, kind: input, shape index: {}]   ;;  %s2905_s11 = inlined_call_operand.vmem [shape: f32[1,256], index: 11, kind: input, shape index: {}]   ;;  %s2906_s12 = inlined_call_operand.<no memory space> [shape: f32[1,1], index: 12, kind: input, shape index: {}]   ;;  %s2907_s13 = inlined_call_operand.vmem [shape: f32[1,128], index: 13, kind: input, shape index: {}]   ;;  %s2908_s14 = inlined_call_operand.<no memory space> [shape: f32[1,1], index: 14, kind: input, shape index: {}]   ;;  %s2909_s15 = inlined_call_operand.vmem [shape: f32[128,256], index: 15, kind: input, shape index: {}]   ;;  %s2910_s16 = inlined_call_operand.vmem [shape: f32[1,256], index: 16, kind: input, shape index: {}]   ;;  %s2911_s17 = inlined_call_operand.vmem [shape: f32[1,256], index: 17, kind: input, shape index: {}]   ;;  %s2912_s18 = inlined_call_operand.vmem [shape: f32[1,256], index: 18, kind: input, shape index: {}]   ;;  %s2913_s19 = inlined_call_operand.vmem [shape: f32[256,256], index: 19, kind: input, shape index: {}]   ;;  %s2914_s20 = inlined_call_operand.vmem [shape: f32[1,256], index: 20, kind: input, shape index: {}]   ;;  %s2915_s21 = inlined_call_operand.vmem [shape: f32[1,256], index: 21, kind: input, shape index: {}]   ;;  %s2916_s22 = inlined_call_operand.vmem [shape: f32[1,256], index: 22, kind: input, shape index: {}]   ;;  %s2917_s23 = inlined_call_operand.vmem [shape: f32[256,128], index: 23, kind: input, shape index: {}]   ;;  %s2918_s24 = inlined_call_operand.vmem [shape: f32[1,128], index: 24, kind: input, shape index: {}]   ;;  %s2919_s25 = inlined_call_operand.hbm [shape: f32[1,128], index: 25, kind: output, shape index: {}]  }
   0x1   :  { %2925 = sst [smem:[#allocation13_spill]] %s2894_s0 }
   0x2   :  { %2926 = sst [smem:[#allocation14_spill]] %s2895_s1 }
   0x3   :  { %2927 = sst [smem:[#allocation15_spill]] %s2896_s2 }
   0x4   :  { %2928 = sst [smem:[#allocation16_spill]] %s2897_s3 }
   0x5   :  { %2929 = sst [smem:[#allocation17_spill]] %s2898_s4 }
   0x6   :  { %2930 = sst [smem:[#allocation18_spill]] %s2899_s5 }
   0x7   :  { %2931 = sst [smem:[#allocation19_spill]] %s2900_s6 }
   0x8   :  { %2932 = sst [smem:[#allocation20_spill]] %s2901_s7 }
   0x9   :  { %2933 = sst [smem:[#allocation21_spill]] %s2902_s8 }
   0xa   :  { %2934 = sst [smem:[#allocation22_spill]] %s2903_s9 }
   0xb   :  { %2935 = sst [smem:[#allocation23_spill]] %s2915_s21 }
   0xc   :  { %2936 = sst [smem:[#allocation24_spill]] %s2916_s22 }
   0xd   :  { %2937 = sst [smem:[#allocation25_spill]] %s2918_s24 }
   0xe   :  { %2938 = sst [smem:[#allocation26_spill]] %s2919_s25 }
   0xf   :  { %30 = sst [smem:[#allocation7]] %s2906_s12 }
  0x10   :  { %31 = sst [smem:[#allocation8]] %s2908_s14 }
  0x11   :  { %32 = vsyncpa [#allocation10], 0  ;;  %s2246_s7 = smov 0  }
  0x12 LB: > { %2939 = sst [smem:[#allocation12_spill]] %s2103_s7  ;;  %s2252_s3 = sadd.s32 4294967295, %s2103_s7   ;;  %s2103_s7 = sphi %s2246_s7, %s38_s7  }
  0x13   : > { %p1880_p0 = scmp.ge.s32.totalorder %s2103_s7, 1  ;;  %p716_p1 = scmp.lt.s32.totalorder %s2103_s7, 4 }
  0x15   : > { %p717_p2 = pnand %p1880_p0, %p716_p1 }
  0x16   : > { %s1881_s12 = sshll.u32 (!%p717_p2), %s2252_s3, 1  ;;  %p804_p3 = scmp.lt.s32.totalorder (!%p717_p2), %s2252_s3, 2 }
  0x17   : > { %720 = sbr.rel (%p717_p2) target bundleno = 1598 (0x63e), region = 120  ;;  %p793_p4 = scmp.lt.s32.totalorder (!%p717_p2), %s1881_s12, 5 }
  0x18   : > { %s2940_s8 = sld [smem:[#allocation15_spill]] (!%p717_p2)  ;;  %p1887_p5 = scmp.ne.s32.totalorder (!%p717_p2), %s2252_s3, 0 }
  0x19   : > { %s2941_s0 = sld [smem:[#allocation13_spill]] (!%p717_p2) }
  0x1a   : > { %s2942_s30 = sld [smem:[#allocation14_spill]] (!%p717_p2) }
  0x1b   : > { %s2943_s22 = sld [smem:[#allocation16_spill]] (!%p717_p2) }
  0x1c   : > { %s2259_s14 = scalar_select %p804_p3, %s2252_s3, 2 }
  0x1d   : > { %s2957_s12 = smov (!%p793_p4, %s1881_s12), 5  ;;  %817 = sbr.rel (%p1887_p5) target bundleno = 211 (0xd3), region = 124 }
  0x1e   : > { %s806_s27 = scalar_lea.vmem %s2940_s8, %s2259_s14  ;;  %s1882_s4 = sshll.u32 %s2957_s12, 3 }
  0x1f   : > { %s1886_s28 = sshll.u32 %s2957_s12, 2  ;;  %s2268_s29 = scalar_lea.vmem %s2941_s0, %s1882_s4 }
  0x20   : > { %s2273_s7 = scalar_lea.vmem %s2942_s30, %s1882_s4  ;;  %s2944_s1 = sld [smem:[#allocation19_spill]] (!%p1887_p5) }
  0x21   : > { %s2278_s21 = scalar_lea.vmem %s2943_s22, %s1886_s28  ;;  %s2945_s28 = sld [smem:[#allocation21_spill]] (!%p1887_p5) }
  0x22   : > { %s2946_s22 = sld [smem:[#allocation17_spill]]  ;;  %vm862_vm0 = vcmask 261120   ;;  %vm1011_vm1 = vcmask 253952   ;;  %v2105_v39 = vmov -1e+30   ;;  %v2106_v41 = vmov 0.0  }
  0x23   : > { %s2947_s6 = sld [smem:[#allocation18_spill]]  ;;  %1012 = vst.msk [vmem:[#allocation4] sm:$0x1] %vm1011_vm1, %v2105_v39 }
  0x24   : > { %s2948_s0 = sld [smem:[#allocation20_spill]]  ;;  %1013 = vst.msk [vmem:[#allocation5] sm:$0x1] %vm1011_vm1, %v2106_v41 }
  0x25   : > { %s2949_s25 = sld [smem:[#allocation22_spill]]  ;;  %1014 = vst [vmem:[#allocation6 + $0x10] sm:$0xff] %v2106_v41 }
  0x26   : > { %v1906_v0 = vld [vmem:[%s2944_s1 + $0x10] sm:$0xf]  ;;  %v2015_v1 = vld [vmem:[%s2944_s1 + $0x14] sm:$0xf0]  ;;  %v2014_v2 = vld [vmem:[%s2944_s1 + $0x14] sm:$0xf] }
  0x27   : > { %v1907_v3 = vor.u32 %v2015_v1, %v1906_v0  ;;  %v1908_v4 = vld [vmem:[%s2944_s1 + $0x18] sm:$0xf0]  ;;  %v1934_v5 = vld [vmem:[%s2945_s28 + $0x10] sm:$0xf]  ;;  %v2021_v6 = vld [vmem:[%s2945_s28 + $0x14] sm:$0xf0] }
  0x28   : > { %v1911_v7 = vor.u32 %v2014_v2, %v1908_v4  ;;  %v1935_v8 = vor.u32 %v2021_v6, %v1934_v5  ;;  %v2020_v9 = vld [vmem:[%s2945_s28 + $0x14] sm:$0xf]  ;;  %v1936_v10 = vld [vmem:[%s2945_s28 + $0x18] sm:$0xf0]  ;;  %v1898_v11 = vld [vmem:[%s2944_s1] sm:$0xf] }
  0x29   : > { %875 = vmatpush.bf16.msra.mxu0 %v1907_v3  ;;  %v1939_v12 = vor.u32 %v2020_v9, %v1936_v10  ;;  %v2013_v13 = vld [vmem:[%s2944_s1 + $0x4] sm:$0xf0]  ;;  %v2012_v14 = vld [vmem:[%s2944_s1 + $0x4] sm:$0xf]  ;;  %v1900_v15 = vld [vmem:[%s2944_s1 + $0x8] sm:$0xf0] }
  0x2a   : > { %894 = vmatpush.bf16.msra.mxu1 %v1911_v7  ;;  %971 = vmatpush.bf16.msra.mxu2 %v1935_v8  ;;  %v1899_v16 = vor.u32 %v2013_v13, %v1898_v11  ;;  %v1903_v17 = vor.u32 %v2012_v14, %v1900_v15  ;;  %v1926_v18 = vld [vmem:[%s2945_s28] sm:$0xf]  ;;  %v2019_v19 = vld [vmem:[%s2945_s28 + $0x4] sm:$0xf0]  ;;  %v2018_v20 = vld [vmem:[%s2945_s28 + $0x4] sm:$0xf] }
  0x2b   : > { %990 = vmatpush.bf16.msra.mxu3 %v1939_v12  ;;  %v1927_v21 = vor.u32 %v2019_v19, %v1926_v18  ;;  %v1928_v22 = vld [vmem:[%s2945_s28 + $0x8] sm:$0xf0]  ;;  %v2010_v24 = vld [vmem:[%s2946_s22] sm:$0xff]  ;;  %1015 = vst [vmem:[#allocation6] sm:$0xff] %v2106_v41 }
  0x2c   : > { %v1931_v23 = vor.u32 %v2018_v20, %v1928_v22  ;;  %v2016_v25 = vld [vmem:[%s2947_s6] sm:$0xff]  ;;  %v2011_v26 = vld [vmem:[%s2946_s22 + $0x8] sm:$0xff]  ;;  %1016 = vst [vmem:[#allocation6 + $0x18] sm:$0xff] %v2106_v41 }
  0x2d   : > { %876 = vmatpush.bf16.msra.mxu0 %v1899_v16  ;;  %v2017_v27 = vld [vmem:[%s2947_s6 + $0x8] sm:$0xff]  ;;  %v826_v28 = vld [vmem:[%s2948_s0] sm:$0x3]  ;;  %1017 = vst [vmem:[#allocation6 + $0x8] sm:$0xff] %v2106_v41 }
  0x2e   : > { %895 = vmatpush.bf16.msra.mxu1 %v1903_v17  ;;  %972 = vmatpush.bf16.msra.mxu2 %v1927_v21  ;;  %v828_v29 = vperm.slane %v826_v28, 0  ;;  %v829_v30 = vperm.slane %v826_v28, 1  ;;  %v923_v32 = vld [vmem:[%s2949_s25] sm:$0x3]  ;;  %1018 = vst [vmem:[#allocation9] sm:$0x1] %v2106_v41 }
  0x2f   : > { %991 = vmatpush.bf16.msra.mxu3 %v1931_v23  ;;  %v925_v36 = vperm.slane %v923_v32, 0  ;;  %v926_v38 = vperm.slane %v923_v32, 1 }
  0x30   : > { %1912 = vmatmul.msk.bf16.vlgmr.msra.gmra.mxu0 %vm862_vm0, %v2010_v24 }
  0x31   : > { %1914 = vmatmul.msk.bf16.vlgmr.msra.gmra.mxu1 %vm862_vm0, %v2010_v24  ;;  %1940 = vmatmul.msk.bf16.vlgmr.msra.gmra.mxu2 %vm862_vm0, %v2016_v25 }
  0x32   : > { %1942 = vmatmul.msk.bf16.vlgmr.msra.gmra.mxu3 %vm862_vm0, %v2016_v25 }
  0x40   : > { %1913 = vmatmul.msk.bf16.gmra.mxu0 %vm862_vm0, %v2011_v26 }
  0x41   : > { %1915 = vmatmul.msk.bf16.gmra.mxu1 %vm862_vm0, %v2011_v26  ;;  %1941 = vmatmul.msk.bf16.gmra.mxu2 %vm862_vm0, %v2017_v27 }
  0x42   : > { %1943 = vmatmul.msk.bf16.gmra.mxu3 %vm862_vm0, %v2017_v27 }
  0xad   : > { %v878_v31 = vpop.f32.mrf.mxu0 }
  0xae   : > { %v879_v33 = vadd.f32 %v878_v31, %v828_v29  ;;  %v897_v34 = vpop.f32.mrf.mxu1 }
  0xaf   : > { %v898_v35 = vadd.f32 %v897_v34, %v829_v30 }
  0xb1   : > { %v907_v37 = vpack.c.bf16 %v898_v35, %v879_v33 }
  0xb3   : > { %911 = vst [vmem:[#allocation2] sm:$0xff] %v907_v37 }
  0xb4   : > { %v974_v40 = vpop.f32.mrf.mxu2 }
  0xb5   : > { %v975_v42 = vadd.f32 %v974_v40, %v925_v36  ;;  %v993_v43 = vpop.f32.mrf.mxu3  ;;  %v880_v44 = vpop.f32.mrf.mxu0 }
  0xb6   : > { %v994_v45 = vadd.f32 %v993_v43, %v926_v38  ;;  %v881_v46 = vadd.f32 %v880_v44, %v828_v29  ;;  %v899_v47 = vpop.f32.mrf.mxu1 }
  0xb7   : > { %v900_v48 = vadd.f32 %v899_v47, %v829_v30 }
  0xb8   : > { %v1003_v49 = vpack.c.bf16 %v994_v45, %v975_v42 }
  0xb9   : > { %v908_v50 = vpack.c.bf16 %v900_v48, %v881_v46 }
  0xba   : > { %1007 = vst [vmem:[#allocation3] sm:$0xff] %v1003_v49 }
  0xbb   : > { %912 = vst [vmem:[#allocation2 + $0x8] sm:$0xff] %v908_v50 }
  0xbc   : > { %v976_v51 = vpop.f32.mrf.mxu2 }
  0xbd   : > { %v977_v52 = vadd.f32 %v976_v51, %v925_v36  ;;  %v995_v53 = vpop.f32.mrf.mxu3  ;;  %v883_v54 = vpop.f32.mrf.mxu0 }
  0xbe   : > { %v996_v55 = vadd.f32 %v995_v53, %v926_v38  ;;  %v884_v56 = vadd.f32 %v883_v54, %v828_v29  ;;  %v902_v57 = vpop.f32.mrf.mxu1 }
  0xbf   : > { %v903_v58 = vadd.f32 %v902_v57, %v829_v30 }
  0xc0   : > { %v1004_v59 = vpack.c.bf16 %v996_v55, %v977_v52 }
  0xc1   : > { %v909_v60 = vpack.c.bf16 %v903_v58, %v884_v56 }
  0xc2   : > { %1008 = vst [vmem:[#allocation3 + $0x8] sm:$0xff] %v1004_v59 }
  0xc3   : > { %913 = vst [vmem:[#allocation2 + $0x10] sm:$0xff] %v909_v60 }
  0xc4   : > { %v979_v61 = vpop.f32.mrf.mxu2 }
  0xc5   : > { %v980_v62 = vadd.f32 %v979_v61, %v925_v36  ;;  %v998_v63 = vpop.f32.mrf.mxu3  ;;  %v885_v0 = vpop.f32.mrf.mxu0 }
  0xc6   : > { %v999_v1 = vadd.f32 %v998_v63, %v926_v38  ;;  %v886_v2 = vadd.f32 %v885_v0, %v828_v29  ;;  %v904_v3 = vpop.f32.mrf.mxu1 }
  0xc7   : > { %v905_v4 = vadd.f32 %v904_v3, %v829_v30 }
  0xc8   : > { %v1005_v5 = vpack.c.bf16 %v999_v1, %v980_v62 }
  0xc9   : > { %v910_v6 = vpack.c.bf16 %v905_v4, %v886_v2 }
  0xca   : > { %1009 = vst [vmem:[#allocation3 + $0x10] sm:$0xff] %v1005_v5 }
  0xcb   : > { %914 = vst [vmem:[#allocation2 + $0x18] sm:$0xff] %v910_v6 }
  0xcc   : > { %v981_v7 = vpop.f32.mrf.mxu2 }
  0xcd   : > { %v982_v8 = vadd.f32 %v981_v7, %v925_v36  ;;  %v1000_v9 = vpop.f32.mrf.mxu3 }
  0xce   : > { %v1001_v10 = vadd.f32 %v1000_v9, %v926_v38 }
  0xd0   : > { %v1006_v11 = vpack.c.bf16 %v1001_v10, %v982_v8 }
  0xd2   : > { %1010 = vst [vmem:[#allocation3 + $0x18] sm:$0xff] %v1006_v11 }
  0xd3 PF: > { %v2348_v12 = vld [vmem:[%s2273_s7] sm:$0xff]  ;;  %v2107_v14 = vmov 0   ;;  %v2024_v16 = vld [vmem:[%s2904_s10 + $0x4] sm:$0xf0]  ;;  %v1960_v19 = vld [vmem:[%s2904_s10 + $0x8] sm:$0xf0]  ;;  %v1024_v48 = vlaneseq }
  0xd4   : > { %v1019_v13 = vld [vmem:[%s2268_s29] sm:$0xff]  ;;  %2053 = vset.pattern.permute.xlu1 %v2107_v14  ;;  %2052 = vset.pattern.permute.xlu0 %v2107_v14  ;;  %vm1097_vm2 = vcmask 130048   ;;  %v2366_v22 = vld [vmem:[%s2273_s7 + $0x8] sm:$0xff]  ;;  %v1994_v24 = vld [vmem:[#allocation3 + $0x10] sm:$0xf]  ;;  %vm1153_vm7 = vcmask 261120  }
  0xd5   : > { %v1958_v15 = vld [vmem:[%s2904_s10] sm:$0xf]  ;;  %1040 = vperm.xlu1 %2053, %v2348_v12   ;;  %1027 = vperm.xlu0 %2052, %v1019_v13   ;;  %v2023_v18 = vld [vmem:[%s2904_s10 + $0x4] sm:$0xf]  ;;  %v1020_v23 = vld [vmem:[%s2268_s29 + $0x8] sm:$0xff]  ;;  %v2375_v51 = vand.u32 127, %v1024_v48 }
  0xd6   : > { %v1959_v17 = vor.u32 %v2024_v16, %v1958_v15  ;;  %v1963_v20 = vor.u32 %v2023_v18, %v1960_v19  ;;  %v2022_v21 = vld [vmem:[%s2278_s21] sm:$0xff]  ;;  %2054 = vset.pattern.permute.xlu2 %v2107_v14  ;;  %v1976_v26 = vld [vmem:[#allocation2 + $0x10] sm:$0xf]  ;;  %v2028_v28 = vld [vmem:[#allocation2 + $0x14] sm:$0xf0]  ;;  %v2108_v54 = vmov 0.0  }
  0xd7   : > { %v2031_v29 = vld [vmem:[#allocation3 + $0x14] sm:$0xf]  ;;  %v1977_v31 = vor.u32 %v2028_v28, %v1976_v26  ;;  %v1968_v33 = vld [vmem:[#allocation2] sm:$0xf]  ;;  %v2026_v34 = vld [vmem:[#allocation2 + $0x4] sm:$0xf0] }
  0xd8   : > { %1108 = vmatpush.bf16.msra.mxu0 %v1959_v17  ;;  %1122 = vmatpush.bf16.msra.mxu1 %v1963_v20  ;;  %v1986_v35 = vld [vmem:[#allocation3] sm:$0xf]  ;;  %v1969_v36 = vor.u32 %v2026_v34, %v1968_v33  ;;  %v2030_v37 = vld [vmem:[#allocation3 + $0x4] sm:$0xf0]  ;;  %v2029_v38 = vld [vmem:[#allocation3 + $0x4] sm:$0xf] }
  0xd9   : > { %v2032_v25 = vld [vmem:[#allocation3 + $0x14] sm:$0xf0]  ;;  %v1996_v30 = vld [vmem:[#allocation3 + $0x18] sm:$0xf0]  ;;  %1163 = vmatpush.bf16.msra.mxu3 %v1977_v31  ;;  %v1988_v39 = vld [vmem:[#allocation3 + $0x8] sm:$0xf0]  ;;  %v1987_v40 = vor.u32 %v2030_v37, %v1986_v35 }
  0xda   : > { %v1995_v27 = vor.u32 %v2032_v25, %v1994_v24  ;;  %v1999_v32 = vor.u32 %v2031_v29, %v1996_v30  ;;  %v1991_v41 = vor.u32 %v2029_v38, %v1988_v39  ;;  %v2027_v42 = vld [vmem:[#allocation2 + $0x14] sm:$0xf]  ;;  %v1978_v43 = vld [vmem:[#allocation2 + $0x18] sm:$0xf0]  ;;  %v2025_v44 = vld [vmem:[#allocation2 + $0x4] sm:$0xf] }
  0xdb   : > { %1964 = vmatmul.msk.bf16.vlgmr.msra.gmra.mxu0 %vm1097_vm2, %v2022_v21  ;;  %1965 = vmatmul.msk.bf16.vlgmr.msra.gmra.mxu1 %vm1097_vm2, %v2022_v21  ;;  %v1981_v45 = vor.u32 %v2027_v42, %v1978_v43  ;;  %v1970_v46 = vld [vmem:[#allocation2 + $0x8] sm:$0xf0]  ;;  %v2402_v63 = vld [vmem:[%s2905_s11] sm:$0x3]  ;;  %s1244_s29 = sld [smem:[#allocation7]]  ;;  %vm1327_vm10 = vcmask 253952  }
  0xdc   : > { %1218 = vmatpush.bf16.msrb.mxu0 %v1995_v27  ;;  %1232 = vmatpush.bf16.msrb.mxu1 %v1999_v32  ;;  %v1973_v47 = vor.u32 %v2025_v44, %v1970_v46  ;;  %v1078_v0 = vperm.slane %v2402_v63, 0  ;;  %v2055_v7 = vld [vmem:[%s2907_s13] ss:$0 sm:$0xff]  ;;  %s1262_s25 = sld [smem:[#allocation8]]  ;;  %v2424_v44 = vshrl.u32 %v1024_v48, 7  ;;  %vm1293_vm14 = vcmp.ge.s32.totalorder %v2348_v12, 0 }
  0xdd   : > { %1043 = vperm.xlu1 %2053, %v2366_v22   ;;  %1030 = vperm.xlu0 %2052, %v1020_v23   ;;  %vm1294_vm15 = vcmp.ge.s32.totalorder %v2366_v22, 0  ;;  %v1079_v12 = vperm.slane %v2402_v63, 1  ;;  %v2056_v22 = vld [vmem:[%s806_s27] ss:$0 sm:$0xff]  ;;  %p2004_p6 = scmp.ne.s32.totalorder %s2252_s3, 2 }
  0xde   : > { %1164 = vmatpush.bf16.msra.mxu3 %v1969_v36  ;;  %v1277_v36 = vld [vmem:[#allocation4] sm:$0x1]  ;;  %vm1362_vm0 = vcmp.eq.s32.totalorder %v2424_v44, %v2375_v51  ;;  %vm1058_vm1 = vcmp.eq.s32.totalorder %v2424_v44, %v2056_v22  ;;  %s2951_s4 = sld [smem:[#allocation23_spill]] (!%p2004_p6) }
  0xdf   : > { %s2952_s2 = sld [smem:[#allocation24_spill]] (!%p2004_p6) }
  0xe0   : > { %1219 = vmatpush.bf16.msrb.mxu0 %v1987_v40  ;;  %1233 = vmatpush.bf16.msrb.mxu1 %v1991_v41  ;;  %s2953_s14 = sld [smem:[#allocation25_spill]] (!%p2004_p6) }
  0xe1   : > { %v1247_v5 = vstv %s1244_s29 }
  0xe2   : > { %1177 = vmatpush.bf16.msrb.mxu3 %v1981_v45  ;;  %v1263_v21 = vstv %s1262_s25 }
  0xe6   : > { %1178 = vmatpush.bf16.msrb.mxu3 %v1973_v47  ;;  %v2429_v47 = vadd.s32 16, %v2424_v44 }
  0xe8   : > { %vm1364_vm11 = vcmp.eq.s32.totalorder %v2429_v47, %v2375_v51 }
 0x147   : > { %v2372_v49 = vpop.permute.xlu1 %1040  ;;  %v1028_v50 = vpop.permute.xlu0 %1027 }
 0x148   : > { %vm1045_vm3 = vcmp.eq.s32.totalorder %v2375_v51, %v2372_v49  ;;  %vm1032_vm4 = vcmp.eq.s32.totalorder %v2375_v51, %v1028_v50  ;;  %v2432_v50 = vadd.s32 8, %v2424_v44 }
 0x149   : > { %v1946_v55 = vsel %vm1045_vm3, 1.0, %v2108_v54  ;;  %v1944_v56 = vsel %vm1032_vm4, 1.0, %v2108_v54 }
 0x14a   : > { %vm1363_vm12 = vcmp.eq.s32.totalorder %v2432_v50, %v2375_v51  ;;  %vm1059_vm4 = vcmp.eq.s32.totalorder %v2432_v50, %v2056_v22 }
 0x14f   : > { %v2380_v52 = vpop.permute.xlu1 %1043  ;;  %v1031_v53 = vpop.permute.xlu0 %1030 }
 0x150   : > { %vm1046_vm5 = vcmp.eq.s32.totalorder %v2375_v51, %v2380_v52  ;;  %vm1033_vm6 = vcmp.eq.s32.totalorder %v2375_v51, %v1031_v53 }
 0x151   : > { %v1947_v57 = vsel %vm1046_vm5, 1.0, %v2108_v54  ;;  %v1945_v58 = vsel %vm1033_vm6, 1.0, %v2108_v54 }
 0x152   : > { %v1051_v59 = vpack.c.bf16 %v1947_v57, %v1946_v55  ;;  %v1038_v60 = vpack.c.bf16 %v1945_v58, %v1944_v56  ;;  %v2442_v55 = vadd.s32 24, %v2424_v44 }
 0x154   : > { %1982 = vmatmul.msk.bf16.vlgmr.msra.gmra.mxu3 %vm1153_vm7, %v1038_v60  ;;  %2000 = vmatmul.msk.bf16.vlgmr.msrb.gmra.mxu0 %vm1153_vm7, %v1051_v59  ;;  %vm1365_vm13 = vcmp.eq.s32.totalorder %v2442_v55, %v2375_v51  ;;  %v1949_v51 = vsel %vm1059_vm4, 1.0, %v2108_v54 }
 0x155   : > { %2001 = vmatmul.msk.bf16.vlgmr.msrb.gmra.mxu1 %vm1153_vm7, %v1051_v59 }
 0x158   : > { %v1110_v61 = vpop.f32.mrf.mxu0 }
 0x159   : > { %v1111_v3 = vadd.f32 %v1110_v61, %v1078_v0 }
 0x160   : > { %v1112_v62 = vpop.f32.mrf.mxu0 }
 0x161   : > { %v1113_v14 = vadd.f32 %v1112_v62, %v1078_v0 }
 0x164   : > { %1983 = vmatmul.msk.bf16.vlgmr.msrb.gmra.mxu3 %vm1153_vm7, %v1038_v60 }
 0x1d1   : > { %v1221_v1 = vpop.f32.mrf.mxu0 }
 0x1d7   : > { %v1166_v2 = vpop.f32.mrf.mxu3 }
 0x1d8   : > { %v1240_v4 = vadd.f32 %v1221_v1, %v1166_v2 }
 0x1d9   : > { %v1223_v10 = vpop.f32.mrf.mxu0 }
 0x1da   : > { %v1242_v6 = vadd.f32 %v1240_v4, %v1111_v3 }
 0x1dc   : > { %vm1245_vm8 = vcmp.ge.f32.partialorder %v1242_v6, 0.0  ;;  %v1248_v8 = vmul.f32 %v1247_v5, %v1242_v6 }
 0x1de   : > { %v1250_v9 = vsel %vm1245_vm8, %v1242_v6, %v1248_v8 }
 0x1df   : > { %v1168_v11 = vpop.f32.mrf.mxu3  ;;  %v1256_v13 = vmul.f32 %v2055_v7, %v1250_v9 }
 0x1e0   : > { %v1241_v15 = vadd.f32 %v1223_v10, %v1168_v11  ;;  %v1124_v11 = vpop.f32.mrf.mxu1 }
 0x1e1   : > { %1258 = vadd.xlane.f32.xlu2 %v1256_v13 }
 0x1e2   : > { %v1243_v16 = vadd.f32 %v1241_v15, %v1113_v14 }
 0x1e4   : > { %vm1246_vm9 = vcmp.ge.f32.partialorder %v1243_v16, 0.0  ;;  %v1249_v17 = vmul.f32 %v1247_v5, %v1243_v16 }
 0x1e6   : > { %v1251_v18 = vsel %vm1246_vm9, %v1243_v16, %v1249_v17  ;;  %v1125_v17 = vadd.f32 %v1124_v11, %v1079_v12 }
 0x1e7   : > { %v1257_v19 = vmul.f32 %v2055_v7, %v1251_v18  ;;  %v1180_v14 = vpop.f32.mrf.mxu3 }
 0x1e8   : > { %v1126_v13 = vpop.f32.mrf.mxu1 }
 0x1e9   : > { %1260 = vadd.xlane.f32.xlu2 %v1257_v19  ;;  %v1127_v19 = vadd.f32 %v1126_v13, %v1079_v12 }
 0x1f0   : > { %v1235_v16 = vpop.f32.mrf.mxu1 }
 0x1f8   : > { %v1237_v49 = vpop.f32.mrf.mxu1 }
 0x254   : > { %v1259_v20 = vpop.xlane.xlu2 %1258 }
 0x255   : > { %v1264_v23 = vadd.f32 %v1263_v21, %v1259_v20 }
 0x257   : > { %v1266_v25 = vsel %vm1045_vm3, %v1264_v23, -1e+30 }
 0x258   : > { %v1268_v28 = vsel %vm1153_vm7, %v1266_v25, -inf  ;;  %v1182_v25 = vpop.f32.mrf.mxu3 }
 0x25c   : > { %v1261_v24 = vpop.xlane.xlu2 %1260 }
 0x25d   : > { %v1265_v26 = vadd.f32 %v1263_v21, %v1261_v24 }
 0x25f   : > { %v1267_v27 = vsel %vm1046_vm5, %v1265_v26, -1e+30 }
 0x260   : > { %v1269_v29 = vsel %vm1153_vm7, %v1267_v27, -inf }
 0x261   : > { %v1270_v30 = vmax.f32 %v1268_v28, %v1269_v29 }
 0x263   : > { %v1271_v31 = vrot.slane %v1270_v30, 4 }
 0x265   : > { %v1272_v32 = vmax.f32 %v1270_v30, %v1271_v31  ;;  %v1948_v30 = vsel %vm1058_vm1, 1.0, %v2108_v54 }
 0x267   : > { %v1273_v33 = vrot.slane %v1272_v32, 2 }
 0x269   : > { %v1274_v34 = vmax.f32 %v1272_v32, %v1273_v33 }
 0x26b   : > { %v1275_v35 = vrot.slane %v1274_v34, 1 }
 0x26d   : > { %v1276_v37 = vmax.f32 %v1274_v34, %v1275_v35  ;;  %v1070_v35 = vpack.c.bf16 %v1949_v51, %v1948_v30 }
 0x26f   : > { %v1278_v38 = vmax.f32 %v1277_v36, %v1276_v37 }
 0x271   : > { %v1283_v39 = vperm.slane %v1278_v38, 0  ;;  %1329 = vst.msk [vmem:[#allocation4] sm:$0x1] %vm1327_vm10, %v1278_v38  ;;  %v1279_v40 = vsub.f32 %v1277_v36, %v1278_v38  ;;  %v1303_v38 = vld [vmem:[#allocation5] sm:$0x1] }
 0x273   : > { %v1286_v41 = vsel %vm1046_vm5, %v1283_v39, 0.0  ;;  %v1280_v42 = vmul.f32 1.442695, %v1279_v40  ;;  %v1285_v43 = vsel %vm1045_vm3, %v1283_v39, 0.0 }
 0x274   : > { %v1290_v45 = vsel %vm1153_vm7, %v1286_v41, 0.0  ;;  %v1287_v46 = vsel %vm1153_vm7, %v1285_v43, 0.0 }
 0x275   : > { %1291 = vadd.xlane.f32.xlu1 %v1290_v45  ;;  %2057 = vpow2.f32 %v1280_v42  ;;  %1288 = vadd.xlane.f32.xlu0 %v1287_v46  ;;  %v1385_v46 = vld [vmem:[#allocation6 + $0x10] sm:$0xff] }
 0x27b   : > { %v2434_v53 = vpop.eup %2057 }
 0x27c   : > { %v1367_v48 = vperm.slane %v2434_v53, 0  ;;  %v1304_v40 = vmul.f32 %v2434_v53, %v1303_v38 }
 0x27e   : > { %v1371_v56 = vsel %vm1364_vm11, %v1367_v48, 0.0  ;;  %v1370_v57 = vsel %vm1363_vm12, %v1367_v48, 0.0  ;;  %v1372_v60 = vsel %vm1365_vm13, %v1367_v48, 0.0  ;;  %v1369_v9 = vsel %vm1362_vm0, %v1367_v48, 0.0 }
 0x27f   : > { %v1379_v58 = vsel %vm1153_vm7, %v1371_v56, 0.0  ;;  %v1376_v59 = vsel %vm1153_vm7, %v1370_v57, 0.0  ;;  %v1382_v61 = vsel %vm1153_vm7, %v1372_v60, 0.0  ;;  %v1373_v10 = vsel %vm1153_vm7, %v1369_v9, 0.0  ;;  %v1386_v57 = vld [vmem:[#allocation6] sm:$0xff]  ;;  %v1387_v60 = vld [vmem:[#allocation6 + $0x18] sm:$0xff] }
 0x280   : > { %1380 = vadd.xlane.f32.xlu1 %v1379_v58  ;;  %1377 = vadd.xlane.f32.xlu0 %v1376_v59 }
 0x288   : > { %1383 = vadd.xlane.f32.xlu0 %v1382_v61 }
 0x2e8   : > { %v1289_v62 = vpop.xlane.xlu0 %1288  ;;  %v1292_v0 = vpop.xlane.xlu1 %1291 }
 0x2e9   : > { %v1295_v1 = vsub.f32 %v1264_v23, %v1289_v62  ;;  %v1296_v3 = vsub.f32 %v1265_v26, %v1292_v0 }
 0x2eb   : > { %v1297_v2 = vmul.f32 1.442695, %v1295_v1  ;;  %v1299_v4 = vmul.f32 1.442695, %v1296_v3  ;;  %v1388_v1 = vld [vmem:[#allocation6 + $0x8] sm:$0xff] }
 0x2ed   : > { %2059 = vpow2.f32 %v1297_v2 }
 0x2ee   : > { %2061 = vpow2.f32 %v1299_v4 }
 0x2f3   : > { %v2060_v5 = vpop.eup %2059  ;;  %v1378_v58 = vpop.xlane.xlu0 %1377 }
 0x2f4   : > { %v1301_v6 = vsel %vm1293_vm14, %v2060_v5, 0.0  ;;  %v2062_v7 = vpop.eup %2061  ;;  %v1381_v61 = vpop.xlane.xlu1 %1380 }
 0x2f5   : > { %1307 = vperm.xlu2 %2054, %v1301_v6   ;;  %v1302_v8 = vsel %vm1294_vm15, %v2062_v7, 0.0  ;;  %v1391_v62 = vmul.f32 %v1387_v60, %v1381_v61 }
 0x2fb   : > { %v1384_v2 = vpop.xlane.xlu0 %1383 }
 0x2fc   : > { %v1392_v3 = vmul.f32 %v1388_v1, %v1384_v2 }
 0x2fd   : > { %1312 = vperm.xlu2 %2054, %v1302_v8  }
 0x326   : > { %1374 = vadd.xlane.f32.xlu2 %v1373_v10 }
 0x34f   : > { %v1308_v15 = vpop.permute.xlu2 %1307 }
 0x350   : > { %v1330_v18 = vmul.f32 %v1308_v15, %v1125_v17  ;;  %v1315_v20 = vsel %vm1045_vm3, %v1308_v15, 0.0  ;;  %vm1060_vm3 = vcmp.eq.s32.totalorder %v2429_v47, %v2056_v22  ;;  %v1390_v47 = vmul.f32 %v1386_v57, %v1378_v58 }
 0x351   : > { %v1317_v26 = vsel %vm1153_vm7, %v1315_v20, 0.0  ;;  %v1950_v43 = vsel %vm1060_vm3, 1.0, %v2108_v54 }
 0x352   : > { %v1332_v23 = vmul.f32 %v1330_v18, %v1180_v14 }
 0x354   : > { %v1334_v32 = vmul.f32 %v1332_v23, %v1235_v16 }
 0x357   : > { %v1313_v21 = vpop.permute.xlu2 %1312 }
 0x358   : > { %v1316_v63 = vsel %vm1046_vm5, %v1313_v21, 0.0  ;;  %v1331_v24 = vmul.f32 %v1313_v21, %v1127_v19  ;;  %vm1061_vm5 = vcmp.eq.s32.totalorder %v2442_v55, %v2056_v22 }
 0x359   : > { %v1318_v27 = vsel %vm1153_vm7, %v1316_v63, 0.0  ;;  %v1951_v44 = vsel %vm1061_vm5, 1.0, %v2108_v54 }
 0x35a   : > { %v1319_v28 = vadd.f32 %v1318_v27, %v1317_v26  ;;  %v1333_v29 = vmul.f32 %v1331_v24, %v1182_v25  ;;  %v1071_v45 = vpack.c.bf16 %v1951_v44, %v1950_v43 }
 0x35c   : > { %v1320_v31 = vrot.slane %v1319_v28, 4  ;;  %v1335_v33 = vmul.f32 %v1333_v29, %v1237_v49 }
 0x35e   : > { %v1321_v52 = vadd.f32 %v1320_v31, %v1319_v28  ;;  %v1336_v34 = vpack.c.bf16 %v1335_v33, %v1334_v32 }
 0x360   : > { %v1322_v36 = vrot.slane %v1321_v52, 2  ;;  %1350 = vmatpush.bf16.msra.mxu2 %v1336_v34 }
 0x362   : > { %v1323_v37 = vadd.f32 %v1322_v36, %v1321_v52 }
 0x363   : > { %2002 = vmatmul.msk.bf16.vlgmr.msra.gmra.mxu2 %vm1097_vm2, %v1070_v35 }
 0x364   : > { %v1324_v39 = vrot.slane %v1323_v37, 1 }
 0x366   : > { %v1325_v41 = vadd.f32 %v1324_v39, %v1323_v37 }
 0x368   : > { %v1326_v42 = vadd.f32 %v1325_v41, %v1304_v40 }
 0x36a   : > { %1328 = vst.msk [vmem:[#allocation5] sm:$0x1] %vm1327_vm10, %v1326_v42 }
 0x373   : > { %2003 = vmatmul.msk.bf16.gmra.mxu2 %vm1097_vm2, %v1071_v45 }
 0x399   : > { %v1375_v50 = vpop.xlane.xlu2 %1374 }
 0x39a   : > { %v1389_v48 = vmul.f32 %v1385_v46, %v1375_v50 }
 0x3e6   : > { %v1352_v56 = vpop.f32.mrf.mxu2 }
 0x3e7   : > { %v1393_v53 = vadd.f32 %v1389_v48, %v1352_v56 }
 0x3e9   : > { %1397 = vst [vmem:[#allocation6 + $0x10] sm:$0xff] %v1393_v53 }
 0x3ee   : > { %v1354_v59 = vpop.f32.mrf.mxu2 }
 0x3ef   : > { %v1394_v55 = vadd.f32 %v1390_v47, %v1354_v59 }
 0x3f1   : > { %1398 = vst [vmem:[#allocation6] sm:$0xff] %v1394_v55 }
 0x3f6   : > { %v1357_v0 = vpop.f32.mrf.mxu2 }
 0x3f7   : > { %v1395_v54 = vadd.f32 %v1391_v62, %v1357_v0 }
 0x3f9   : > { %1399 = vst [vmem:[#allocation6 + $0x18] sm:$0xff] %v1395_v54 }
 0x3fd   : > { %1404 = sbr.rel (%p2004_p6) target bundleno = 1587 (0x633), region = 128 }
 0x3fe   : > { %v1359_v4 = vpop.f32.mrf.mxu2 }
 0x3ff   : > { %v1396_v5 = vadd.f32 %v1392_v3, %v1359_v4 }
 0x401   : > { %1400 = vst [vmem:[#allocation6 + $0x8] sm:$0xff] %v1396_v5 }
 0x402   : > { %v1425_v7 = vld [vmem:[#allocation6 + $0x18] sm:$0xff]  ;;  %v1424_v8 = vld [vmem:[#allocation6] sm:$0xff]  ;;  %v1480_v10 = vld [vmem:[%s2909_s15 + $0xf0] sm:$0xff] }
 0x403   : > { %v1405_v9 = vld [vmem:[#allocation5] sm:$0x1]  ;;  %1488 = vmatpush.msra.mxu1 %v1480_v10  ;;  %v1481_v11 = vld [vmem:[%s2909_s15 + $0xf8] sm:$0xff]  ;;  %v1479_v12 = vld [vmem:[%s2909_s15 + $0xe8] sm:$0xff] }
 0x404   : > { %2063 = vrcp.f32 %v1405_v9  ;;  %v1478_v13 = vld [vmem:[%s2909_s15 + $0xe0] sm:$0xff]  ;;  %1508 = vmatpush.msra.mxu2 %v1481_v11  ;;  %v1476_v14 = vld [vmem:[%s2909_s15 + $0xd0] sm:$0xff]  ;;  %v1477_v16 = vld [vmem:[%s2909_s15 + $0xd8] sm:$0xff]  ;;  %v1418_v63 = vand.u32 2147483648, %v1405_v9  ;;  %vm1412_vm2 = vweird.f32 %v1405_v9  ;;  %v1416_v26 = vand.u32 2147483647, %v1405_v9 }
 0x405   : > { %v1423_v15 = vld [vmem:[#allocation6 + $0x10] sm:$0xff]  ;;  %1489 = vmatpush.msra.mxu1 %v1478_v13  ;;  %v1474_v17 = vld [vmem:[%s2909_s15 + $0xc0] sm:$0xff]  ;;  %v1475_v18 = vld [vmem:[%s2909_s15 + $0xc8] sm:$0xff]  ;;  %vm1406_vm10 = vcmp.gt.f32.partialorder %v1405_v9, 0.0 }
 0x406   : > { %1509 = vmatpush.msra.mxu2 %v1479_v12  ;;  %v1472_v22 = vld [vmem:[%s2909_s15 + $0xb0] sm:$0xff]  ;;  %v1473_v20 = vld [vmem:[%s2909_s15 + $0xb8] sm:$0xff]  ;;  %v1470_v23 = vld [vmem:[%s2909_s15 + $0xa0] sm:$0xff]  ;;  %v1419_v30 = vor.u32 1.1754944e-38, %v1418_v63  ;;  %vm1417_vm9 = vcmp.eq.f32.partialorder %v1416_v26, 8.507059e+37 }
 0x407   : > { %1490 = vmatpush.msra.mxu1 %v1476_v14  ;;  %v1471_v24 = vld [vmem:[%s2909_s15 + $0xa8] sm:$0xff]  ;;  %v1468_v27 = vld [vmem:[%s2909_s15 + $0x90] sm:$0xff]  ;;  %v1469_v28 = vld [vmem:[%s2909_s15 + $0x98] sm:$0xff] }
 0x408   : > { %v1426_v6 = vld [vmem:[#allocation6 + $0x8] sm:$0xff]  ;;  %1510 = vmatpush.msra.mxu2 %v1477_v16  ;;  %v1466_v49 = vld [vmem:[%s2909_s15 + $0x80] sm:$0xff]  ;;  %v1465_v51 = vld [vmem:[%s2909_s15 + $0x78] sm:$0xff] }
 0x409   : > { %1442 = vmatpush.msra.mxu0 %v1426_v6  ;;  %1491 = vmatpush.msra.mxu1 %v1474_v17  ;;  %v1467_v31 = vld [vmem:[%s2909_s15 + $0x88] sm:$0xff]  ;;  %v1464_v33 = vld [vmem:[%s2909_s15 + $0x70] sm:$0xff]  ;;  %v1462_v34 = vld [vmem:[%s2909_s15 + $0x60] sm:$0xff] }
 0x40a   : > { %v2064_v19 = vpop.eup %2063  ;;  %1511 = vmatpush.msra.mxu2 %v1475_v18  ;;  %v1463_v36 = vld [vmem:[%s2909_s15 + $0x68] sm:$0xff]  ;;  %v1460_v38 = vld [vmem:[%s2909_s15 + $0x50] sm:$0xff]  ;;  %v1461_v39 = vld [vmem:[%s2909_s15 + $0x58] sm:$0xff] }
 0x40b   : > { %1443 = vmatpush.msra.mxu0 %v1425_v7  ;;  %v1408_v21 = vmul.f32 %v2064_v19, %v1405_v9  ;;  %1492 = vmatpush.msra.mxu1 %v1472_v22  ;;  %vm1413_vm6 = vweird.f32 %v2064_v19  ;;  %v1458_v40 = vld [vmem:[%s2909_s15 + $0x40] sm:$0xff]  ;;  %v1459_v41 = vld [vmem:[%s2909_s15 + $0x48] sm:$0xff]  ;;  %v1456_v42 = vld [vmem:[%s2909_s15 + $0x30] sm:$0xff] }
 0x40c   : > { %1512 = vmatpush.msra.mxu2 %v1473_v20  ;;  %vm1414_vm8 = vmor %vm1412_vm2, %vm1413_vm6  ;;  %v1457_v43 = vld [vmem:[%s2909_s15 + $0x38] sm:$0xff]  ;;  %v1454_v44 = vld [vmem:[%s2909_s15 + $0x20] sm:$0xff] }
 0x40d   : > { %1444 = vmatpush.msra.mxu0 %v1424_v8  ;;  %v1409_v25 = vsub.f32 1.0, %v1408_v21  ;;  %1493 = vmatpush.msra.mxu1 %v1470_v23  ;;  %v1455_v45 = vld [vmem:[%s2909_s15 + $0x28] sm:$0xff]  ;;  %v1452_v46 = vld [vmem:[%s2909_s15 + $0x10] sm:$0xff]  ;;  %v1453_v50 = vld [vmem:[%s2909_s15 + $0x18] sm:$0xff] }
 0x40e   : > { %1513 = vmatpush.msra.mxu2 %v1471_v24  ;;  %v1450_v48 = vld [vmem:[%s2909_s15] sm:$0xff]  ;;  %v1451_v56 = vld [vmem:[%s2909_s15 + $0x8] sm:$0xff]  ;;  %v1580_v53 = vld [vmem:[%s2913_s19 + $0xf0] sm:$0xff] }
 0x40f   : > { %1445 = vmatpush.msra.mxu0 %v1423_v15  ;;  %v1410_v29 = vmul.f32 %v2064_v19, %v1409_v25  ;;  %1494 = vmatpush.msra.mxu1 %v1468_v27  ;;  %v1581_v57 = vld [vmem:[%s2913_s19 + $0xf8] sm:$0xff]  ;;  %v1578_v58 = vld [vmem:[%s2913_s19 + $0xe0] sm:$0xff]  ;;  %v1579_v47 = vld [vmem:[%s2913_s19 + $0xe8] sm:$0xff] }
 0x410   : > { %1514 = vmatpush.msra.mxu2 %v1469_v28  ;;  %1620 = vmatpush.msra.mxu3 %v1580_v53  ;;  %v1576_v59 = vld [vmem:[%s2913_s19 + $0xd0] sm:$0xff]  ;;  %v1577_v55 = vld [vmem:[%s2913_s19 + $0xd8] sm:$0xff]  ;;  %v1610_v62 = vld [vmem:[%s2913_s19 + $0x1e0] sm:$0xff] }
 0x411   : > { %v1411_v32 = vadd.f32 %v2064_v19, %v1410_v29  ;;  %1495 = vmatpush.msra.mxu1 %v1466_v49  ;;  %v1612_v60 = vld [vmem:[%s2913_s19 + $0x1f0] sm:$0xff]  ;;  %v1613_v61 = vld [vmem:[%s2913_s19 + $0x1f8] sm:$0xff]  ;;  %v1574_v0 = vld [vmem:[%s2913_s19 + $0xc0] sm:$0xff] }
 0x412   : > { %1515 = vmatpush.msra.mxu2 %v1467_v31  ;;  %1621 = vmatpush.msra.mxu3 %v1578_v58  ;;  %v1575_v54 = vld [vmem:[%s2913_s19 + $0xc8] sm:$0xff]  ;;  %v1608_v2 = vld [vmem:[%s2913_s19 + $0x1d0] sm:$0xff]  ;;  %v1609_v3 = vld [vmem:[%s2913_s19 + $0x1d8] sm:$0xff] }
 0x413   : > { %v1415_v52 = vsel %vm1414_vm8, %v2064_v19, %v1411_v32  ;;  %1496 = vmatpush.msra.mxu1 %v1464_v33  ;;  %1640 = vmatpush.msrb.mxu0 %v1612_v60  ;;  %v1611_v1 = vld [vmem:[%s2913_s19 + $0x1e8] sm:$0xff]  ;;  %v1572_v4 = vld [vmem:[%s2913_s19 + $0xb0] sm:$0xff]  ;;  %v1573_v5 = vld [vmem:[%s2913_s19 + $0xb8] sm:$0xff] }
 0x414   : > { %v1420_v35 = vsel %vm1417_vm9, %v1419_v30, %v1415_v52  ;;  %1516 = vmatpush.msra.mxu2 %v1465_v51  ;;  %1622 = vmatpush.msra.mxu3 %v1576_v59  ;;  %v1606_v6 = vld [vmem:[%s2913_s19 + $0x1c0] sm:$0xff]  ;;  %v1607_v7 = vld [vmem:[%s2913_s19 + $0x1c8] sm:$0xff]  ;;  %v1604_v10 = vld [vmem:[%s2913_s19 + $0x1b0] sm:$0xff] }
 0x415   : > { %v1422_v37 = vsel %vm1406_vm10, %v1420_v35, 0.0  ;;  %1497 = vmatpush.msra.mxu1 %v1462_v34  ;;  %1641 = vmatpush.msrb.mxu0 %v1610_v62  ;;  %v1570_v8 = vld [vmem:[%s2913_s19 + $0xa0] sm:$0xff]  ;;  %v1571_v9 = vld [vmem:[%s2913_s19 + $0xa8] sm:$0xff]  ;;  %v1605_v11 = vld [vmem:[%s2913_s19 + $0x1b8] sm:$0xff] }
 0x416   : > { %2005 = vmatmul.msk.f32.vlgmr.msra.gmra.mxu0 %vm1153_vm7, %v1422_v37  ;;  %1517 = vmatpush.msra.mxu2 %v1463_v36  ;;  %v1568_v13 = vld [vmem:[%s2913_s19 + $0x90] sm:$0xff]  ;;  %v1569_v12 = vld [vmem:[%s2913_s19 + $0x98] sm:$0xff]  ;;  %v1602_v14 = vld [vmem:[%s2913_s19 + $0x1a0] sm:$0xff] }
 0x417   : > { %1498 = vmatpush.msra.mxu1 %v1460_v38  ;;  %1623 = vmatpush.msra.mxu3 %v1574_v0  ;;  %v1603_v15 = vld [vmem:[%s2913_s19 + $0x1a8] sm:$0xff]  ;;  %v1566_v16 = vld [vmem:[%s2913_s19 + $0x80] sm:$0xff]  ;;  %v1600_v18 = vld [vmem:[%s2913_s19 + $0x190] sm:$0xff] }
 0x418   : > { %1518 = vmatpush.msra.mxu2 %v1461_v39  ;;  %1642 = vmatpush.msrb.mxu0 %v1608_v2  ;;  %v1567_v17 = vld [vmem:[%s2913_s19 + $0x88] sm:$0xff]  ;;  %v1601_v22 = vld [vmem:[%s2913_s19 + $0x198] sm:$0xff]  ;;  %v1564_v19 = vld [vmem:[%s2913_s19 + $0x70] sm:$0xff] }
 0x419   : > { %1499 = vmatpush.msra.mxu1 %v1458_v40  ;;  %1624 = vmatpush.msra.mxu3 %v1572_v4  ;;  %v1565_v20 = vld [vmem:[%s2913_s19 + $0x78] sm:$0xff]  ;;  %v1598_v21 = vld [vmem:[%s2913_s19 + $0x180] sm:$0xff]  ;;  %v1599_v23 = vld [vmem:[%s2913_s19 + $0x188] sm:$0xff] }
 0x41a   : > { %1519 = vmatpush.msra.mxu2 %v1459_v41  ;;  %1643 = vmatpush.msrb.mxu0 %v1606_v6  ;;  %v1562_v63 = vld [vmem:[%s2913_s19 + $0x60] sm:$0xff]  ;;  %v1563_v24 = vld [vmem:[%s2913_s19 + $0x68] sm:$0xff]  ;;  %v1560_v25 = vld [vmem:[%s2913_s19 + $0x50] sm:$0xff] }
 0x41b   : > { %1500 = vmatpush.msra.mxu1 %v1456_v42  ;;  %1625 = vmatpush.msra.mxu3 %v1570_v8  ;;  %v1561_v26 = vld [vmem:[%s2913_s19 + $0x58] sm:$0xff]  ;;  %v1558_v28 = vld [vmem:[%s2913_s19 + $0x40] sm:$0xff]  ;;  %v1596_v29 = vld [vmem:[%s2913_s19 + $0x170] sm:$0xff] }
 0x41c   : > { %1520 = vmatpush.msra.mxu2 %v1457_v43  ;;  %1644 = vmatpush.msrb.mxu0 %v1604_v10  ;;  %v1559_v49 = vld [vmem:[%s2913_s19 + $0x48] sm:$0xff]  ;;  %v1597_v30 = vld [vmem:[%s2913_s19 + $0x178] sm:$0xff]  ;;  %v1556_v31 = vld [vmem:[%s2913_s19 + $0x30] sm:$0xff] }
 0x41d   : > { %1501 = vmatpush.msra.mxu1 %v1454_v44  ;;  %1626 = vmatpush.msra.mxu3 %v1568_v13  ;;  %v1594_v32 = vld [vmem:[%s2913_s19 + $0x160] sm:$0xff]  ;;  %v1557_v33 = vld [vmem:[%s2913_s19 + $0x38] sm:$0xff]  ;;  %v1595_v51 = vld [vmem:[%s2913_s19 + $0x168] sm:$0xff] }
 0x41e   : > { %1521 = vmatpush.msra.mxu2 %v1455_v45  ;;  %1645 = vmatpush.msrb.mxu0 %v1602_v14  ;;  %v1554_v52 = vld [vmem:[%s2913_s19 + $0x20] sm:$0xff]  ;;  %v1592_v34 = vld [vmem:[%s2913_s19 + $0x150] sm:$0xff]  ;;  %v1555_v35 = vld [vmem:[%s2913_s19 + $0x28] sm:$0xff] }
 0x41f   : > { %1502 = vmatpush.msra.mxu1 %v1452_v46  ;;  %1627 = vmatpush.msra.mxu3 %v1566_v16  ;;  %v1593_v36 = vld [vmem:[%s2913_s19 + $0x158] sm:$0xff]  ;;  %v1552_v37 = vld [vmem:[%s2913_s19 + $0x10] sm:$0xff]  ;;  %v1590_v38 = vld [vmem:[%s2913_s19 + $0x140] sm:$0xff] }
 0x420   : > { %1522 = vmatpush.msra.mxu2 %v1453_v50  ;;  %1646 = vmatpush.msrb.mxu0 %v1600_v18  ;;  %v1553_v39 = vld [vmem:[%s2913_s19 + $0x18] sm:$0xff]  ;;  %v1591_v40 = vld [vmem:[%s2913_s19 + $0x148] sm:$0xff]  ;;  %v1550_v41 = vld [vmem:[%s2913_s19] sm:$0xff] }
 0x421   : > { %1503 = vmatpush.msra.mxu1 %v1450_v48  ;;  %1628 = vmatpush.msra.mxu3 %v1564_v19  ;;  %v1588_v42 = vld [vmem:[%s2913_s19 + $0x130] sm:$0xff]  ;;  %v1551_v43 = vld [vmem:[%s2913_s19 + $0x8] sm:$0xff]  ;;  %v1589_v44 = vld [vmem:[%s2913_s19 + $0x138] sm:$0xff] }
 0x422   : > { %1523 = vmatpush.msra.mxu2 %v1451_v56  ;;  %1647 = vmatpush.msrb.mxu0 %v1598_v21  ;;  %v1586_v45 = vld [vmem:[%s2913_s19 + $0x120] sm:$0xff]  ;;  %v1587_v46 = vld [vmem:[%s2913_s19 + $0x128] sm:$0xff]  ;;  %v1584_v50 = vld [vmem:[%s2913_s19 + $0x110] sm:$0xff] }
 0x423   : > { %1660 = vmatpush.msrb.mxu1 %v1581_v57  ;;  %1629 = vmatpush.msra.mxu3 %v1562_v63  ;;  %v1585_v48 = vld [vmem:[%s2913_s19 + $0x118] sm:$0xff]  ;;  %v1582_v56 = vld [vmem:[%s2913_s19 + $0x100] sm:$0xff]  ;;  %v1583_v53 = vld [vmem:[%s2913_s19 + $0x108] sm:$0xff] }
 0x424   : > { %1680 = vmatpush.msrb.mxu2 %v1613_v61  ;;  %1648 = vmatpush.msrb.mxu0 %v1596_v29  ;;  %v1737_v57 = vld [vmem:[%s2917_s23 + $0x78] sm:$0xff]  ;;  %v1736_v58 = vld [vmem:[%s2917_s23 + $0x70] sm:$0xff]  ;;  %v1751_v60 = vld [vmem:[%s2917_s23 + $0xe8] sm:$0xff] }
 0x425   : > { %1661 = vmatpush.msrb.mxu1 %v1579_v47  ;;  %1630 = vmatpush.msra.mxu3 %v1560_v25  ;;  %v1753_v47 = vld [vmem:[%s2917_s23 + $0xf8] sm:$0xff]  ;;  %v1752_v59 = vld [vmem:[%s2917_s23 + $0xf0] sm:$0xff]  ;;  %v1734_v61 = vld [vmem:[%s2917_s23 + $0x60] sm:$0xff] }
 0x426   : > { %1681 = vmatpush.msrb.mxu2 %v1611_v1  ;;  %1649 = vmatpush.msrb.mxu0 %v1594_v32  ;;  %v1750_v62 = vld [vmem:[%s2917_s23 + $0xe0] sm:$0xff]  ;;  %v1733_v0 = vld [vmem:[%s2917_s23 + $0x58] sm:$0xff]  ;;  %v1732_v1 = vld [vmem:[%s2917_s23 + $0x50] sm:$0xff] }
 0x427   : > { %1662 = vmatpush.msrb.mxu1 %v1577_v55  ;;  %1631 = vmatpush.msra.mxu3 %v1558_v28  ;;  %v1735_v55 = vld [vmem:[%s2917_s23 + $0x68] sm:$0xff]  ;;  %v1482_v2 = vld [vmem:[%s2910_s16] sm:$0x3]  ;;  %v1729_v25 = vld [vmem:[%s2917_s23 + $0x38] sm:$0xff] }
 0x428   : > { %1682 = vmatpush.msrb.mxu2 %v1609_v3  ;;  %1650 = vmatpush.msrb.mxu0 %v1592_v34  ;;  %v1731_v3 = vld [vmem:[%s2917_s23 + $0x48] sm:$0xff]  ;;  %v1484_v4 = vperm.slane %v1482_v2, 0  ;;  %v1542_v8 = vld [vmem:[%s2912_s18] sm:$0x3]  ;;  %v1725_v32 = vld [vmem:[%s2917_s23 + $0x18] sm:$0xff] }
 0x429   : > { %1663 = vmatpush.msrb.mxu1 %v1575_v54  ;;  %1632 = vmatpush.msra.mxu3 %v1556_v31  ;;  %v1749_v54 = vld [vmem:[%s2917_s23 + $0xd8] sm:$0xff]  ;;  %v1544_v13 = vperm.slane %v1542_v8, 0  ;;  %v1545_v19 = vperm.slane %v1542_v8, 1  ;;  %v1730_v63 = vld [vmem:[%s2917_s23 + $0x40] sm:$0xff]  ;;  %v1727_v29 = vld [vmem:[%s2917_s23 + $0x28] sm:$0xff] }
 0x42a   : > { %1683 = vmatpush.msrb.mxu2 %v1607_v7  ;;  %1651 = vmatpush.msrb.mxu0 %v1590_v38  ;;  %v1746_v28 = vld [vmem:[%s2917_s23 + $0xc0] sm:$0xff]  ;;  %v1744_v31 = vld [vmem:[%s2917_s23 + $0xb0] sm:$0xff]  ;;  %v1723_v34 = vld [vmem:[%s2917_s23 + $0x8] sm:$0xff] }
 0x42b   : > { %1664 = vmatpush.msrb.mxu1 %v1573_v5  ;;  %1633 = vmatpush.msra.mxu3 %v1554_v52  ;;  %v1534_v5 = vld [vmem:[%s2911_s17] sm:$0x3]  ;;  %v1739_v38 = vld [vmem:[%s2917_s23 + $0x88] sm:$0xff] }
 0x42c   : > { %1684 = vmatpush.msrb.mxu2 %v1605_v11  ;;  %1652 = vmatpush.msrb.mxu0 %v1588_v42  ;;  %v1485_v11 = vperm.slane %v1482_v2, 1  ;;  %v1742_v52 = vld [vmem:[%s2917_s23 + $0xa0] sm:$0xff] }
 0x42d   : > { %1665 = vmatpush.msrb.mxu1 %v1571_v9  ;;  %1634 = vmatpush.msra.mxu3 %v1552_v37  ;;  %v1536_v9 = vperm.slane %v1534_v5, 0  ;;  %v1740_v37 = vld [vmem:[%s2917_s23 + $0x90] sm:$0xff] }
 0x42e   : > { %1685 = vmatpush.msrb.mxu2 %v1603_v15  ;;  %1653 = vmatpush.msrb.mxu0 %v1586_v45  ;;  %v1706_v45 = vld [vmem:[%s2951_s4] sm:$0x3] }
 0x42f   : > { %1666 = vmatpush.msrb.mxu1 %v1569_v12  ;;  %1635 = vmatpush.msra.mxu3 %v1550_v41 }
 0x430   : > { %1686 = vmatpush.msrb.mxu2 %v1601_v22  ;;  %1654 = vmatpush.msrb.mxu0 %v1584_v50 }
 0x431   : > { %1667 = vmatpush.msrb.mxu1 %v1567_v17  ;;  %1755 = vmatpush.msrb.mxu3 %v1737_v57  ;;  %v1537_v17 = vperm.slane %v1534_v5, 1  ;;  %v1754_v5 = vld [vmem:[%s2953_s14] sm:$0x1] }
 0x432   : > { %1687 = vmatpush.msrb.mxu2 %v1599_v23  ;;  %1655 = vmatpush.msrb.mxu0 %v1582_v56  ;;  %v1714_v56 = vld [vmem:[%s2952_s2] sm:$0x3] }
 0x433   : > { %1668 = vmatpush.msrb.mxu1 %v1565_v20  ;;  %1756 = vmatpush.msrb.mxu3 %v1736_v58 }
 0x434   : > { %1688 = vmatpush.msrb.mxu2 %v1597_v30  ;;  %1775 = vmatpush.msra.mxu0 %v1753_v47  ;;  %v1726_v30 = vld [vmem:[%s2917_s23 + $0x20] sm:$0xff] }
 0x435   : > { %1669 = vmatpush.msrb.mxu1 %v1563_v24  ;;  %1757 = vmatpush.msrb.mxu3 %v1735_v55  ;;  %v1748_v24 = vld [vmem:[%s2917_s23 + $0xd0] sm:$0xff] }
 0x436   : > { %1689 = vmatpush.msrb.mxu2 %v1595_v51  ;;  %1776 = vmatpush.msra.mxu0 %v1752_v59  ;;  %v1724_v51 = vld [vmem:[%s2917_s23 + $0x10] sm:$0xff]  ;;  %v1716_v59 = vperm.slane %v1714_v56, 0 }
 0x437   : > { %1670 = vmatpush.msrb.mxu1 %v1561_v26  ;;  %1758 = vmatpush.msrb.mxu3 %v1734_v61  ;;  %v1747_v26 = vld [vmem:[%s2917_s23 + $0xc8] sm:$0xff]  ;;  %v1709_v61 = vperm.slane %v1706_v45, 1 }
 0x438   : > { %1690 = vmatpush.msrb.mxu2 %v1593_v36  ;;  %1777 = vmatpush.msra.mxu0 %v1751_v60  ;;  %v1722_v36 = vld [vmem:[%s2917_s23] sm:$0xff] }
 0x439   : > { %1671 = vmatpush.msrb.mxu1 %v1559_v49  ;;  %1759 = vmatpush.msrb.mxu3 %v1733_v0  ;;  %v1745_v49 = vld [vmem:[%s2917_s23 + $0xb8] sm:$0xff] }
 0x43a   : > { %1691 = vmatpush.msrb.mxu2 %v1591_v40  ;;  %1778 = vmatpush.msra.mxu0 %v1750_v62  ;;  %v1614_v40 = vld [vmem:[%s2914_s20] sm:$0x3] }
 0x43b   : > { %1672 = vmatpush.msrb.mxu1 %v1557_v33  ;;  %1760 = vmatpush.msrb.mxu3 %v1732_v1  ;;  %v1743_v33 = vld [vmem:[%s2917_s23 + $0xa8] sm:$0xff]  ;;  %v1616_v41 = vperm.slane %v1614_v40, 0 }
 0x43c   : > { %1692 = vmatpush.msrb.mxu2 %v1589_v44  ;;  %1779 = vmatpush.msra.mxu0 %v1749_v54  ;;  %v1717_v54 = vperm.slane %v1714_v56, 1 }
 0x43d   : > { %1673 = vmatpush.msrb.mxu1 %v1555_v35  ;;  %1761 = vmatpush.msrb.mxu3 %v1731_v3  ;;  %v1741_v35 = vld [vmem:[%s2917_s23 + $0x98] sm:$0xff] }
 0x43e   : > { %1693 = vmatpush.msrb.mxu2 %v1587_v46  ;;  %1780 = vmatpush.msra.mxu0 %v1748_v24 }
 0x43f   : > { %1674 = vmatpush.msrb.mxu1 %v1553_v39  ;;  %1762 = vmatpush.msrb.mxu3 %v1730_v63  ;;  %v1738_v39 = vld [vmem:[%s2917_s23 + $0x80] sm:$0xff] }
 0x440   : > { %1694 = vmatpush.msrb.mxu2 %v1585_v48  ;;  %1781 = vmatpush.msra.mxu0 %v1747_v26 }
 0x441   : > { %1675 = vmatpush.msrb.mxu1 %v1551_v43  ;;  %1763 = vmatpush.msrb.mxu3 %v1729_v25  ;;  %v1617_v43 = vperm.slane %v1614_v40, 1 }
 0x442   : > { %1695 = vmatpush.msrb.mxu2 %v1583_v53  ;;  %1782 = vmatpush.msra.mxu0 %v1746_v28  ;;  %v1708_v53 = vperm.slane %v1706_v45, 0 }
 0x444   : > { %1783 = vmatpush.msra.mxu0 %v1745_v49 }
 0x446   : > { %1784 = vmatpush.msra.mxu0 %v1744_v31 }
 0x448   : > { %1785 = vmatpush.msra.mxu0 %v1743_v33 }
 0x44a   : > { %1786 = vmatpush.msra.mxu0 %v1742_v52 }
 0x44c   : > { %1787 = vmatpush.msra.mxu0 %v1741_v35 }
 0x44e   : > { %1788 = vmatpush.msra.mxu0 %v1740_v37 }
 0x450   : > { %1789 = vmatpush.msra.mxu0 %v1739_v38 }
 0x452   : > { %1790 = vmatpush.msra.mxu0 %v1738_v39 }
 0x493   : > { %v1447_v27 = vpop.f32.mrf.mxu0 }
 0x494   : > { %1504 = vmatmul.f32.vlgmr.msra.gmra.mxu1 %v1447_v27  ;;  %1524 = vmatmul.f32.vlgmr.msra.gmra.mxu2 %v1447_v27  ;;  %v1728_v27 = vld [vmem:[%s2917_s23 + $0x30] sm:$0xff] }
 0x495   : > { %1764 = vmatpush.msrb.mxu3 %v1728_v27 }
 0x497   : > { %1765 = vmatpush.msrb.mxu3 %v1727_v29 }
 0x499   : > { %1766 = vmatpush.msrb.mxu3 %v1726_v30 }
 0x49b   : > { %1767 = vmatpush.msrb.mxu3 %v1725_v32 }
 0x49d   : > { %1768 = vmatpush.msrb.mxu3 %v1724_v51 }
 0x49f   : > { %1769 = vmatpush.msrb.mxu3 %v1723_v34 }
 0x4a1   : > { %1770 = vmatpush.msrb.mxu3 %v1722_v36 }
 0x511   : > { %v1505_v6 = vpop.f32.mrf.mxu1 }
 0x512   : > { %v1506_v7 = vadd.f32 %v1505_v6, %v1484_v4 }
 0x514   : > { %vm1528_vm7 = vcmp.ge.f32.partialorder %v1506_v7, 0.0  ;;  %v1530_v10 = vmul.f32 0.01, %v1506_v7 }
 0x516   : > { %v1532_v12 = vsel %vm1528_vm7, %v1506_v7, %v1530_v10 }
 0x517   : > { %v1525_v14 = vpop.f32.mrf.mxu2  ;;  %v1540_v15 = vmul.f32 %v1536_v9, %v1532_v12 }
 0x518   : > { %v1526_v16 = vadd.f32 %v1525_v14, %v1485_v11 }
 0x519   : > { %v1548_v18 = vadd.f32 %v1544_v13, %v1540_v15 }
 0x51a   : > { %vm1529_vm11 = vcmp.ge.f32.partialorder %v1526_v16, 0.0  ;;  %v1531_v22 = vmul.f32 0.01, %v1526_v16 }
 0x51b   : > { %1636 = vmatmul.f32.vlgmr.msra.gmra.mxu3 %v1548_v18  ;;  %1676 = vmatmul.f32.vlgmr.msrb.gmra.mxu1 %v1548_v18 }
 0x51c   : > { %v1533_v20 = vsel %vm1529_vm11, %v1526_v16, %v1531_v22 }
 0x51d   : > { %v1541_v21 = vmul.f32 %v1537_v17, %v1533_v20 }
 0x51f   : > { %v1549_v23 = vadd.f32 %v1545_v19, %v1541_v21 }
 0x521   : > { %1656 = vmatmul.f32.vlgmr.msrb.gmra.mxu0 %v1549_v23  ;;  %1696 = vmatmul.f32.vlgmr.msrb.gmra.mxu2 %v1549_v23 }
 0x598   : > { %v1677_v46 = vpop.f32.mrf.mxu1 }
 0x599   : > { %v1678_v57 = vadd.f32 %v1677_v46, %v1617_v43 }
 0x59e   : > { %v1637_v42 = vpop.f32.mrf.mxu3  ;;  %v1657_v50 = vpop.f32.mrf.mxu0 }
 0x59f   : > { %v1638_v44 = vadd.f32 %v1637_v42, %v1616_v41 }
 0x5a1   : > { %v1658_v48 = vadd.f32 %v1657_v50, %v1638_v44 }
 0x5a3   : > { %vm1700_vm12 = vcmp.ge.f32.partialorder %v1658_v48, 0.0  ;;  %v1702_v58 = vmul.f32 0.01, %v1658_v48 }
 0x5a4   : > { %v1697_v47 = vpop.f32.mrf.mxu2 }
 0x5a5   : > { %v1704_v55 = vsel %vm1700_vm12, %v1658_v48, %v1702_v58  ;;  %v1698_v60 = vadd.f32 %v1697_v47, %v1678_v57 }
 0x5a6   : > { %v1712_v62 = vmul.f32 %v1708_v53, %v1704_v55 }
 0x5a7   : > { %vm1701_vm13 = vcmp.ge.f32.partialorder %v1698_v60, 0.0  ;;  %v1703_v0 = vmul.f32 0.01, %v1698_v60 }
 0x5a8   : > { %v1720_v1 = vadd.f32 %v1716_v59, %v1712_v62 }
 0x5a9   : > { %v1705_v2 = vsel %vm1701_vm13, %v1698_v60, %v1703_v0 }
 0x5aa   : > { %v1713_v3 = vmul.f32 %v1709_v61, %v1705_v2  ;;  %1771 = vmatmul.f32.vlgmr.msrb.gmra.mxu3 %v1720_v1 }
 0x5ac   : > { %v1721_v4 = vadd.f32 %v1717_v54, %v1713_v3 }
 0x5ae   : > { %1791 = vmatmul.f32.vlgmr.msra.gmra.mxu0 %v1721_v4 }
 0x62b   : > { %v1792_v8 = vpop.f32.mrf.mxu0 }
 0x62d   : > { %v1772_v6 = vpop.f32.mrf.mxu3 }
 0x62e   : > { %v1773_v7 = vadd.f32 %v1772_v6, %v1754_v5 }
 0x630   : > { %v1793_v9 = vadd.f32 %v1792_v8, %v1773_v7 }
 0x632   : > { %1795 = vst [vmem:[#allocation9] sm:$0x1] %v1793_v9 }
 0x633 PF: > { %p2037_p7 = scmp.eq.s32.totalorder %s2252_s3, 2  ;;  %s2109_s27 = smov [#allocation9]  }
 0x634   : > { %s1802_s12 = sshll.u32 %s2109_s27, 4  ;;  %s2954_s5 = sld [smem:[#allocation26_spill]]  ;;  %s1803_s12 = int_to_ptr.vmem [resolvable:$true] %s1802_s12 }
 0x63a   : > { %s1804_s0 = sshll.u32 %s2954_s5, 4  ;;  %s1805_s0 = int_to_ptr.hbm [resolvable:$true] %s1804_s0 }
 0x63b   : > { %2034 = dma.vmem_to_hbm [thread:$0]  (%p2037_p7), %s1803_s12, 16, %s1805_s0, [#allocation10]  }
 0x63c   : > { %2098 = dma.done.wait (%p2037_p7), [#allocation10], 16  }
 0x63d   : > { %2100 = vsyncadd (%p2037_p7), [#allocation10], 4294967280 }
 0x63e PF: > { %s2955_s21 = sld [smem:[#allocation12_spill]] }
 0x644   : > { %s38_s7 = sadd.s32 1, %s2955_s21  }
 0x645   : > { %p35_p8 = scmp.ge.s32.totalorder %s38_s7, 5  }
 0x647   :  { %37 = sbr.rel (!%p35_p8) target bundleno = 18 (0x12), region = 164 }
 0x64c   :  { %1818 = vsyncpa [#allocation10], 1 }
 0x64d   :  { %1820 = vsyncpa [#allocation10 + $0x1], 1 }

</bundles_post_ra>
